<compile_context>
chip_gen: v6e
topology: v6e:2x2x1
jax: 0.10.0
libtpu: 0.0.40
codegen_flags: <defaults>
</compile_context>

<pallas_src>
import functools

import jax
import jax.numpy as jnp
from jax.experimental import pallas as pl
from jax.experimental.pallas import tpu as pltpu

LANE = 128
SUBLANE = 8


def _round_up(n, m):
    return ((n + m - 1) // m) * m


def _pad2(a, rows, cols):
    r, c = a.shape
    return jnp.pad(a, ((0, rows - r), (0, cols - c)))


def koopman_kernel(x_ref, w1_ref, b1_ref, wcat_ref, bcat_ref, w4_ref, b4_ref,
                   out_ref, *, out_dim, in_dim):
    """Fused Koopman forward on one batch tile.

    Output slab layout (width round_up(2*out_dim + in_dim, 128)):
        out[:, 0:out_dim]                      = y
        out[:, out_dim:2*out_dim]              = y_next
        out[:, 2*out_dim:2*out_dim+in_dim]     = x_next
    """
    x = x_ref[...].astype(jnp.bfloat16)                       # (bb, in_dim)

    # observable_net layer 1: Linear + ReLU  (f32 accumulate, f32 bias/ReLU)
    h1 = jnp.dot(x, w1_ref[...], preferred_element_type=jnp.float32) + b1_ref[...]
    h1 = jnp.maximum(h1, 0.0)

    # Folded wide matmul: [y | y_next | h2_pre] in one MXU pass.
    wide = jnp.dot(h1.astype(jnp.bfloat16), wcat_ref[...],
                   preferred_element_type=jnp.float32) + bcat_ref[...]

    # recovery_net: ReLU over the FULL wide slab (y / y_next / pad lanes map to
    # all-zero rows of w4_ref, so they contribute nothing), then last Linear.
    h2 = jnp.maximum(wide, 0.0)
    x_next = jnp.dot(h2.astype(jnp.bfloat16), w4_ref[...],
                     preferred_element_type=jnp.float32) + b4_ref[...]

    # Two static stores into the packed, lane-dense output slab.
    out_ref[:, :2 * out_dim] = wide[:, :2 * out_dim]          # y | y_next
    out_ref[:, 2 * out_dim:2 * out_dim + in_dim] = x_next      # x_next


def pack_params(params):
    """One-time packing (outside the jitted forward): fold K and the recovery
    first layer into the observable second layer, lane-pad, cast weights to
    bf16.  Biases stay f32 (added after f32 accumulation)."""
    w1, b1, w2, b2, k, w3, b3, w4, b4 = params
    input_dim, hidden_dim = w1.shape
    output_dim = w2.shape[1]

    p_h = _round_up(hidden_dim, LANE)
    wide_dim = 2 * output_dim + hidden_dim          # [y | y_next | h2_pre]
    p_wide = _round_up(wide_dim, LANE)

    # Exact algebraic fold, done in f32 and rounded to bf16 once.
    w2k = w2 @ k                                    # (hidden, out)
    w2kw3 = w2k @ w3                                # (hidden, hidden)
    b2k = b2 @ k                                    # (1, out)
    b2kw3 = b2k @ w3 + b3                           # (1, hidden)
    wcat = jnp.concatenate([w2, w2k, w2kw3], axis=1)    # (hidden, wide_dim)
    bcat = jnp.concatenate([b2, b2k, b2kw3], axis=1)    # (1, wide_dim)

    # W4 consumes the full (post-ReLU) wide slab: rows for the y / y_next
    # lanes and padding are zero, rows [2*out : 2*out+hidden] hold W4.
    w4_full = jnp.zeros((p_wide, input_dim), jnp.float32)
    w4_full = w4_full.at[2 * output_dim:2 * output_dim + hidden_dim, :].set(w4)

    packed = (
        _pad2(w1, input_dim, p_h).astype(jnp.bfloat16),   # (in, p_h)
        _pad2(b1, 1, p_h).astype(jnp.float32),            # (1, p_h)
        _pad2(wcat, p_h, p_wide).astype(jnp.bfloat16),    # (p_h, p_wide)
        _pad2(bcat, 1, p_wide).astype(jnp.float32),       # (1, p_wide)
        w4_full.astype(jnp.bfloat16),                     # (p_wide, in)
        b4.astype(jnp.float32),                           # (1, in)
    )
    return packed


@functools.partial(jax.jit, static_argnames=("output_dim", "block_b"))
def koopman_forward(x, packed, *, output_dim, block_b=1024):
    """x: (B, input_dim) float32; packed: output of pack_params.
    Returns (y, y_next, x_next) in float32."""
    B, input_dim = x.shape
    w1, b1, wcat, bcat, w4, b4 = packed
    p_slab = _round_up(2 * output_dim + input_dim, LANE)

    # Batch tile: big (amortizes ~0.35 us/step overhead), clamped to B.
    bb = min(block_b, _round_up(B, SUBLANE))
    bb = _round_up(bb, SUBLANE)
    grid = (pl.cdiv(B, bb),)

    # Replicated (weight) operands: full-array block, constant block index ->
    # resident in VMEM across grid steps (no re-DMA).
    def rep(a):
        return pl.BlockSpec(a.shape, lambda i: (0, 0))

    in_specs = [
        pl.BlockSpec((bb, input_dim), lambda i: (i, 0)),  # x tile (unpadded)
        rep(w1), rep(b1), rep(wcat), rep(bcat), rep(w4), rep(b4),
    ]
    out_specs = pl.BlockSpec((bb, p_slab), lambda i: (i, 0))
    out_shape = jax.ShapeDtypeStruct((B, p_slab), jnp.float32)

    # Explicit VMEM budget with headroom (well under v7x's 64 MiB per core):
    # double-buffered x tile + output tile + resident weights.
    weight_bytes = sum(a.size * a.dtype.itemsize for a in packed)
    vmem_est = 2 * bb * input_dim * 4 + 2 * bb * p_slab * 4 + 2 * weight_bytes
    vmem_limit = min(48 * 1024 * 1024, max(16 * 1024 * 1024, 2 * vmem_est))

    p_h = w1.shape[1]
    p_wide = wcat.shape[1]
    flops = 2 * B * (input_dim * p_h + p_h * p_wide + p_wide * input_dim)
    bytes_accessed = B * input_dim * 4 + B * p_slab * 4 + weight_bytes
    cost = pl.CostEstimate(flops=flops, transcendentals=0,
                           bytes_accessed=bytes_accessed)

    out = pl.pallas_call(
        functools.partial(koopman_kernel, out_dim=output_dim, in_dim=input_dim),
        grid=grid,
        in_specs=in_specs,
        out_specs=out_specs,
        out_shape=out_shape,
        compiler_params=pltpu.CompilerParams(
            dimension_semantics=("parallel",),
            vmem_limit_bytes=vmem_limit),
        cost_estimate=cost,
    )(x, w1, b1, wcat, bcat, w4, b4)

    y = out[:, :output_dim]
    y_next = out[:, output_dim:2 * output_dim]
    x_next = out[:, 2 * output_dim:2 * output_dim + input_dim]
    return y, y_next, x_next


def init_params(key, input_dim, output_dim, hidden_dim):
    """Init matching the PyTorch module.

    Linear weights: kaiming_normal_(mode='fan_in', nonlinearity='relu')
      -> normal * sqrt(2 / fan_in); biases: PyTorch default uniform.
    Weights are returned pre-transposed to (in, out); K is 0.01 * randn.
    """
    keys = jax.random.split(key, 9)

    def kaiming(k, fan_in, fan_out):
        std = (2.0 / fan_in) ** 0.5
        # PyTorch weight is (out, in); transpose to (in, out) for the kernel.
        return (std * jax.random.normal(k, (fan_out, fan_in), jnp.float32)).T

    def bias(k, fan_in, fan_out):
        bound = 1.0 / (fan_in ** 0.5)
        return jax.random.uniform(k, (1, fan_out), jnp.float32, -bound, bound)

    w1 = kaiming(keys[0], input_dim, hidden_dim)
    b1 = bias(keys[1], input_dim, hidden_dim)
    w2 = kaiming(keys[2], hidden_dim, output_dim)
    b2 = bias(keys[3], hidden_dim, output_dim)
    k_matrix = (0.01 * jax.random.normal(keys[4], (output_dim * output_dim,),
                                         jnp.float32)).reshape(output_dim,
                                                               output_dim)
    w3 = kaiming(keys[5], output_dim, hidden_dim)
    b3 = bias(keys[6], output_dim, hidden_dim)
    w4 = kaiming(keys[7], hidden_dim, input_dim)
    b4 = bias(keys[8], hidden_dim, input_dim)
    return (w1, b1, w2, b2, k_matrix, w3, b3, w4, b4)


def reference_forward(x, params):
    """Pure-JAX f32 reference of KoopmanNetwork.forward (PyTorch semantics)."""
    w1, b1, w2, b2, k, w3, b3, w4, b4 = params
    h1 = jnp.maximum(x @ w1 + b1, 0.0)
    y = h1 @ w2 + b2
    y_next = y @ k                      # bmm with broadcast K == plain matmul
    h2 = jnp.maximum(y_next @ w3 + b3, 0.0)
    x_next = h2 @ w4 + b4
    return y, y_next, x_next


if __name__ == "__main__":
    # Small model dims consistent with the module; batch gives one full tile.
    B, input_dim, output_dim, hidden_dim = 512, 16, 32, 64

    key = jax.random.PRNGKey(0)
    kx, kp = jax.random.split(key)
    x = jax.random.normal(kx, (B, input_dim), jnp.float32)
    params = init_params(kp, input_dim, output_dim, hidden_dim)
    packed = pack_params(params)        # one-time pad / fold / bf16 cast

    y, y_next, x_next = koopman_forward(x, packed, output_dim=output_dim,
                                        block_b=1024)
    jax.block_until_ready((y, y_next, x_next))

    y_ref, ynext_ref, xnext_ref = reference_forward(x, params)
    assert y.shape == (B, output_dim)
    assert y_next.shape == (B, output_dim)
    assert x_next.shape == (B, input_dim)
    # Tolerance reflects intentional bf16 MXU inputs vs the f32 reference.
    assert jnp.allclose(y, y_ref, atol=3e-2, rtol=3e-2)
    assert jnp.allclose(y_next, ynext_ref, atol=3e-2, rtol=3e-2)
    assert jnp.allclose(x_next, xnext_ref, atol=3e-2, rtol=3e-2)

    print("KERNEL_OK")
</pallas_src>

<mosaic_0001>
module attributes {stable_mosaic.version = 11 : i64} {
  func.func @koopman_kernel(%arg0: i32, %arg1: memref<512x16xf32, #tpu.memory_space<vmem>>, %arg2: memref<16x128xbf16, #tpu.memory_space<vmem>>, %arg3: memref<1x128xf32, #tpu.memory_space<vmem>>, %arg4: memref<128x128xbf16, #tpu.memory_space<vmem>>, %arg5: memref<1x128xf32, #tpu.memory_space<vmem>>, %arg6: memref<128x16xbf16, #tpu.memory_space<vmem>>, %arg7: memref<1x16xf32, #tpu.memory_space<vmem>>, %arg8: memref<512x128xf32, #tpu.memory_space<vmem>>) attributes {dimension_semantics = [#tpu.dimension_semantics<parallel>], iteration_bounds = array<i64: 1>, scalar_prefetch = 0 : i64, scratch_operands = 0 : i64, tpu.core_type = #tpu.core_type<tc>, window_params = [{transform_indices = @transform_0, window_bounds = array<i64: 512, 16>}, {pipeline_mode = #tpu.pipeline_mode<synchronous>, transform_indices = @transform_1, window_bounds = array<i64: 16, 128>}, {pipeline_mode = #tpu.pipeline_mode<synchronous>, transform_indices = @transform_2, window_bounds = array<i64: 1, 128>}, {pipeline_mode = #tpu.pipeline_mode<synchronous>, transform_indices = @transform_3, window_bounds = array<i64: 128, 128>}, {pipeline_mode = #tpu.pipeline_mode<synchronous>, transform_indices = @transform_4, window_bounds = array<i64: 1, 128>}, {pipeline_mode = #tpu.pipeline_mode<synchronous>, transform_indices = @transform_5, window_bounds = array<i64: 128, 16>}, {pipeline_mode = #tpu.pipeline_mode<synchronous>, transform_indices = @transform_6, window_bounds = array<i64: 1, 16>}, {transform_indices = @transform_7, window_bounds = array<i64: 512, 128>}]} {
    %c0 = arith.constant 0 : index
    %c0_0 = arith.constant 0 : index
    %0 = vector.load %arg1[%c0, %c0_0] : memref<512x16xf32, #tpu.memory_space<vmem>>, vector<512x16xf32>
    %1 = arith.truncf %0 : vector<512x16xf32> to vector<512x16xbf16>
    %c0_1 = arith.constant 0 : index
    %c0_2 = arith.constant 0 : index
    %2 = vector.load %arg2[%c0_1, %c0_2] : memref<16x128xbf16, #tpu.memory_space<vmem>>, vector<16x128xbf16>
    %cst = arith.constant dense<0.000000e+00> : vector<512x128xf32>
    %3 = tpu.matmul %1, %2, %cst {dimension_numbers = #tpu.dot_dimension_numbers<[1], [0], [0], [1], [0, 0, 1, 1], [], []>} : vector<512x16xbf16>, vector<16x128xbf16>, vector<512x128xf32> -> vector<512x128xf32>
    %c0_3 = arith.constant 0 : index
    %c0_4 = arith.constant 0 : index
    %4 = vector.load %arg3[%c0_3, %c0_4] : memref<1x128xf32, #tpu.memory_space<vmem>>, vector<1x128xf32>
    %5 = vector.broadcast %4 : vector<1x128xf32> to vector<512x128xf32>
    %6 = arith.addf %3, %5 : vector<512x128xf32>
    %cst_5 = arith.constant 0.000000e+00 : f32
    %7 = vector.broadcast %cst_5 : f32 to vector<512x128xf32>
    %8 = arith.maximumf %6, %7 : vector<512x128xf32>
    %9 = arith.truncf %8 : vector<512x128xf32> to vector<512x128xbf16>
    %c0_6 = arith.constant 0 : index
    %c0_7 = arith.constant 0 : index
    %10 = vector.load %arg4[%c0_6, %c0_7] : memref<128x128xbf16, #tpu.memory_space<vmem>>, vector<128x128xbf16>
    %cst_8 = arith.constant dense<0.000000e+00> : vector<512x128xf32>
    %11 = tpu.matmul %9, %10, %cst_8 {dimension_numbers = #tpu.dot_dimension_numbers<[1], [0], [0], [1], [0, 0, 1, 1], [], []>} : vector<512x128xbf16>, vector<128x128xbf16>, vector<512x128xf32> -> vector<512x128xf32>
    %c0_9 = arith.constant 0 : index
    %c0_10 = arith.constant 0 : index
    %12 = vector.load %arg5[%c0_9, %c0_10] : memref<1x128xf32, #tpu.memory_space<vmem>>, vector<1x128xf32>
    %13 = vector.broadcast %12 : vector<1x128xf32> to vector<512x128xf32>
    %14 = arith.addf %11, %13 : vector<512x128xf32>
    %cst_11 = arith.constant 0.000000e+00 : f32
    %15 = vector.broadcast %cst_11 : f32 to vector<512x128xf32>
    %16 = arith.maximumf %14, %15 : vector<512x128xf32>
    %17 = arith.truncf %16 : vector<512x128xf32> to vector<512x128xbf16>
    %c0_12 = arith.constant 0 : index
    %c0_13 = arith.constant 0 : index
    %18 = vector.load %arg6[%c0_12, %c0_13] : memref<128x16xbf16, #tpu.memory_space<vmem>>, vector<128x16xbf16>
    %cst_14 = arith.constant dense<0.000000e+00> : vector<512x16xf32>
    %19 = tpu.matmul %17, %18, %cst_14 {dimension_numbers = #tpu.dot_dimension_numbers<[1], [0], [0], [1], [0, 0, 1, 1], [], []>} : vector<512x128xbf16>, vector<128x16xbf16>, vector<512x16xf32> -> vector<512x16xf32>
    %c0_15 = arith.constant 0 : index
    %c0_16 = arith.constant 0 : index
    %20 = vector.load %arg7[%c0_15, %c0_16] : memref<1x16xf32, #tpu.memory_space<vmem>>, vector<1x16xf32>
    %21 = vector.broadcast %20 : vector<1x16xf32> to vector<512x16xf32>
    %22 = arith.addf %19, %21 : vector<512x16xf32>
    %23 = vector.extract_strided_slice %14 {offsets = [0, 0], sizes = [512, 64], strides = [1, 1]} : vector<512x128xf32> to vector<512x64xf32>
    %c0_17 = arith.constant 0 : index
    %c0_18 = arith.constant 0 : index
    %24 = vector.load %arg8[%c0_17, %c0_18] : memref<512x128xf32, #tpu.memory_space<vmem>>, vector<512x64xf32>
    tpu.vector_store %arg8[%c0_17, %c0_18], %23 {strides = array<i32>} : memref<512x128xf32, #tpu.memory_space<vmem>>, vector<512x64xf32>,
    %c0_19 = arith.constant 0 : index
    %c64 = arith.constant 64 : index
    %25 = vector.load %arg8[%c0_19, %c64] : memref<512x128xf32, #tpu.memory_space<vmem>>, vector<512x16xf32>
    tpu.vector_store %arg8[%c0_19, %c64], %22 {strides = array<i32>} : memref<512x128xf32, #tpu.memory_space<vmem>>, vector<512x16xf32>,
    return
  }
  func.func @transform_0(%arg0: i32) -> (i32, i32) {
    %c0_i32 = arith.constant 0 : i32
    %c0_i32_0 = arith.constant 0 : i32
    return %arg0, %c0_i32 : i32, i32
  }
  func.func @transform_1(%arg0: i32) -> (i32, i32) {
    %c0_i32 = arith.constant 0 : i32
    %c0_i32_0 = arith.constant 0 : i32
    %c0_i32_1 = arith.constant 0 : i32
    return %c0_i32, %c0_i32_0 : i32, i32
  }
  func.func @transform_2(%arg0: i32) -> (i32, i32) {
    %c0_i32 = arith.constant 0 : i32
    %c0_i32_0 = arith.constant 0 : i32
    %c0_i32_1 = arith.constant 0 : i32
    return %c0_i32, %c0_i32_0 : i32, i32
  }
  func.func @transform_3(%arg0: i32) -> (i32, i32) {
    %c0_i32 = arith.constant 0 : i32
    %c0_i32_0 = arith.constant 0 : i32
    %c0_i32_1 = arith.constant 0 : i32
    return %c0_i32, %c0_i32_0 : i32, i32
  }
  func.func @transform_4(%arg0: i32) -> (i32, i32) {
    %c0_i32 = arith.constant 0 : i32
    %c0_i32_0 = arith.constant 0 : i32
    %c0_i32_1 = arith.constant 0 : i32
    return %c0_i32, %c0_i32_0 : i32, i32
  }
  func.func @transform_5(%arg0: i32) -> (i32, i32) {
    %c0_i32 = arith.constant 0 : i32
    %c0_i32_0 = arith.constant 0 : i32
    %c0_i32_1 = arith.constant 0 : i32
    return %c0_i32, %c0_i32_0 : i32, i32
  }
  func.func @transform_6(%arg0: i32) -> (i32, i32) {
    %c0_i32 = arith.constant 0 : i32
    %c0_i32_0 = arith.constant 0 : i32
    %c0_i32_1 = arith.constant 0 : i32
    return %c0_i32, %c0_i32_0 : i32, i32
  }
  func.func @transform_7(%arg0: i32) -> (i32, i32) {
    %c0_i32 = arith.constant 0 : i32
    %c0_i32_0 = arith.constant 0 : i32
    return %arg0, %c0_i32 : i32, i32
  }
}

</mosaic_0001>

<bundles_post_ra>
// kernel: koopman_forward.1
= control target key start
LH: loop header
LB: loop body
LE: loop exit
PB: predicated region body
PF: predicated region fallthrough
CT: control target
= control target key end

     0   :  { %vm138_vm0 = vcmask 130048   ;;  %vm1436_vm1 = vcmask 523264   ;;  %s2237_s29 = smov 64   ;;  %vm1757_vm2 = vcmask 654848   ;;  %s3396_s1 = inlined_call_operand.vmem [shape: bf16[16,128], index: 1, kind: input, shape index: {}]   ;;  %s3397_s0 = inlined_call_operand.vmem [shape: f32[512,16], index: 0, kind: input, shape index: {}]   ;;  %s3398_s3 = inlined_call_operand.vmem [shape: bf16[128,128], index: 3, kind: input, shape index: {}]   ;;  %s3399_s2 = inlined_call_operand.vmem [shape: f32[1,128], index: 2, kind: input, shape index: {}]   ;;  %s3400_s5 = inlined_call_operand.vmem [shape: bf16[128,16], index: 5, kind: input, shape index: {}]   ;;  %s3401_s4 = inlined_call_operand.vmem [shape: f32[1,128], index: 4, kind: input, shape index: {}]   ;;  %s3402_s7 = inlined_call_operand.vmem [shape: f32[512,128], index: 7, kind: output, shape index: {}]   ;;  %s3403_s6 = inlined_call_operand.vmem [shape: f32[1,16], index: 6, kind: input, shape index: {}]  }
   0x1   :  { %v2220_v0 = vld [vmem:[%s3396_s1] sm:$0xff]   ;;  %v28_v2 = vld [vmem:[%s3397_s0 + $0x8] sm:$0xff]  ;;  %v29_v3 = vld [vmem:[%s3397_s0 + $0x10] sm:$0xff] }
   0x2   :  { %v27_v1 = vld [vmem:[%s3397_s0] sm:$0xff]  ;;  %1991 = vmatprep.subr.bf16.mxu0 %v2220_v0  ;;  %v30_v5 = vld [vmem:[%s3397_s0 + $0x18] sm:$0xff]  ;;  %v32_v7 = vld [vmem:[%s3397_s0 + $0x28] sm:$0xff]  ;;  %2217 = vmatprep.subr.bf16.mxu1 %v2220_v0 }
   0x3   :  { %v91_v4 = vpack.c.bf16 %v28_v2, %v27_v1  ;;  %v31_v6 = vld [vmem:[%s3397_s0 + $0x20] sm:$0xff]  ;;  %1992 = vmatpush3.bf16.msra.mxu0 %v2220_v0  ;;  %v92_v8 = vpack.c.bf16 %v30_v5, %v29_v3  ;;  %2218 = vmatpush3.bf16.msra.mxu1 %v2220_v0  ;;  %v33_v10 = vld [vmem:[%s3397_s0 + $0x30] sm:$0xff]  ;;  %v34_v11 = vld [vmem:[%s3397_s0 + $0x38] sm:$0xff] }
   0x4   :  { %v93_v9 = vpack.c.bf16 %v32_v7, %v31_v6  ;;  %v35_v12 = vld [vmem:[%s3397_s0 + $0x40] sm:$0xff]  ;;  %v36_v13 = vld [vmem:[%s3397_s0 + $0x48] sm:$0xff]  ;;  %v94_v14 = vpack.c.bf16 %v34_v11, %v33_v10  ;;  %v61_v18 = vld [vmem:[%s3397_s0 + $0x110] sm:$0xff] }
   0x5   :  { %1993 = vmatprep.mubr.msk.bf16.mxu0 %vm138_vm0, %v91_v4  ;;  %v95_v15 = vpack.c.bf16 %v36_v13, %v35_v12  ;;  %v59_v16 = vld [vmem:[%s3397_s0 + $0x100] sm:$0xff]  ;;  %v60_v17 = vld [vmem:[%s3397_s0 + $0x108] sm:$0xff]  ;;  %v62_v19 = vld [vmem:[%s3397_s0 + $0x118] sm:$0xff] }
   0x6   :  { %1994 = vmatmul.mubr.msk.bf16.vlgmr.msra.gmra.mxu0 %vm138_vm0, %v92_v8  ;;  %v107_v20 = vpack.c.bf16 %v60_v17, %v59_v16  ;;  %v108_v21 = vpack.c.bf16 %v62_v19, %v61_v18  ;;  %v63_v22 = vld [vmem:[%s3397_s0 + $0x120] sm:$0xff]  ;;  %v64_v23 = vld [vmem:[%s3397_s0 + $0x128] sm:$0xff]  ;;  %v37_v25 = vld [vmem:[%s3397_s0 + $0x50] sm:$0xff] }
   0x7   :  { %1997 = vmatprep.mubr.msk.bf16.mxu0 %vm138_vm0, %v93_v9  ;;  %v109_v24 = vpack.c.bf16 %v64_v23, %v63_v22  ;;  %v38_v26 = vld [vmem:[%s3397_s0 + $0x58] sm:$0xff]  ;;  %v39_v27 = vld [vmem:[%s3397_s0 + $0x60] sm:$0xff]  ;;  %v40_v28 = vld [vmem:[%s3397_s0 + $0x68] sm:$0xff] }
   0x8   :  { %2025 = vmatprep.mubr.msk.bf16.mxu1 %vm138_vm0, %v107_v20  ;;  %v65_v29 = vld [vmem:[%s3397_s0 + $0x130] sm:$0xff]  ;;  %v66_v30 = vld [vmem:[%s3397_s0 + $0x138] sm:$0xff]  ;;  %v96_v31 = vpack.c.bf16 %v38_v26, %v37_v25  ;;  %v67_v32 = vld [vmem:[%s3397_s0 + $0x140] sm:$0xff]  ;;  %v97_v34 = vpack.c.bf16 %v40_v28, %v39_v27 }
   0x9   :  { %2026 = vmatmul.mubr.msk.bf16.vlgmr.msra.gmra.mxu1 %vm138_vm0, %v108_v21  ;;  %v68_v33 = vld [vmem:[%s3397_s0 + $0x148] sm:$0xff]  ;;  %v110_v35 = vpack.c.bf16 %v66_v30, %v65_v29  ;;  %v41_v36 = vld [vmem:[%s3397_s0 + $0x70] sm:$0xff]  ;;  %v42_v37 = vld [vmem:[%s3397_s0 + $0x78] sm:$0xff] }
   0xa   :  { %2029 = vmatprep.mubr.msk.bf16.mxu1 %vm138_vm0, %v109_v24  ;;  %v111_v38 = vpack.c.bf16 %v68_v33, %v67_v32  ;;  %v43_v39 = vld [vmem:[%s3397_s0 + $0x80] sm:$0xff]  ;;  %v44_v40 = vld [vmem:[%s3397_s0 + $0x88] sm:$0xff]  ;;  %v69_v41 = vld [vmem:[%s3397_s0 + $0x150] sm:$0xff]  ;;  %v98_v46 = vpack.c.bf16 %v42_v37, %v41_v36 }
   0xb   :  { %v70_v42 = vld [vmem:[%s3397_s0 + $0x158] sm:$0xff]  ;;  %v2222_v44 = vld [vmem:[%s3398_s3 + $0x30] sm:$0xff]   ;;  %v71_v45 = vld [vmem:[%s3397_s0 + $0x160] sm:$0xff]  ;;  %v99_v48 = vpack.c.bf16 %v44_v40, %v43_v39 }
   0xc   :  { %v2221_v43 = vld [vmem:[%s3398_s3 + $0x38] sm:$0xff]   ;;  %v72_v47 = vld [vmem:[%s3397_s0 + $0x168] sm:$0xff]  ;;  %v112_v50 = vpack.c.bf16 %v70_v42, %v69_v41  ;;  %v45_v52 = vld [vmem:[%s3397_s0 + $0x90] sm:$0xff] }
   0xd   :  { %2057 = vmatprep.subr.bf16.mxu1 %v2221_v43  ;;  %v2223_v49 = vld [vmem:[%s3398_s3 + $0x28] sm:$0xff]   ;;  %v113_v51 = vpack.c.bf16 %v72_v47, %v71_v45  ;;  %v46_v53 = vld [vmem:[%s3397_s0 + $0x98] sm:$0xff]  ;;  %v2224_v54 = vld [vmem:[%s3398_s3 + $0x20] sm:$0xff]  }
   0xe   :  { %1998 = vmatmul.mubr.msk.bf16.gmra.mxu0 %vm138_vm0, %v94_v14  ;;  %2058 = vmatpush3.bf16.msra.mxu1 %v2221_v43  ;;  %v47_v55 = vld [vmem:[%s3397_s0 + $0xa0] sm:$0xff]  ;;  %v48_v56 = vld [vmem:[%s3397_s0 + $0xa8] sm:$0xff]  ;;  %v73_v57 = vld [vmem:[%s3397_s0 + $0x170] sm:$0xff]  ;;  %v100_v59 = vpack.c.bf16 %v46_v53, %v45_v52 }
   0xf   :  { %2001 = vmatprep.mubr.msk.bf16.mxu0 %vm138_vm0, %v95_v15  ;;  %2059 = vmatprep.subr.bf16.mxu1 %v2222_v44  ;;  %v74_v58 = vld [vmem:[%s3397_s0 + $0x178] sm:$0xff]  ;;  %v75_v60 = vld [vmem:[%s3397_s0 + $0x180] sm:$0xff]  ;;  %v76_v61 = vld [vmem:[%s3397_s0 + $0x188] sm:$0xff]  ;;  %v101_v62 = vpack.c.bf16 %v48_v56, %v47_v55 }
  0x10   :  { %v2225_v63 = vld [vmem:[%s3398_s3 + $0x18] sm:$0xff]   ;;  %v114_v0 = vpack.c.bf16 %v74_v58, %v73_v57  ;;  %v115_v1 = vpack.c.bf16 %v76_v61, %v75_v60  ;;  %v49_v2 = vld [vmem:[%s3397_s0 + $0xb0] sm:$0xff]  ;;  %v51_v5 = vld [vmem:[%s3397_s0 + $0xc0] sm:$0xff] }
  0x11   :  { %2030 = vmatmul.mubr.msk.bf16.gmra.mxu1 %vm138_vm0, %v110_v35  ;;  %v50_v3 = vld [vmem:[%s3397_s0 + $0xb8] sm:$0xff]  ;;  %v2226_v4 = vld [vmem:[%s3398_s3 + $0x10] sm:$0xff]   ;;  %v52_v6 = vld [vmem:[%s3397_s0 + $0xc8] sm:$0xff] }
  0x12   :  { %2033 = vmatprep.mubr.msk.bf16.mxu1 %vm138_vm0, %v111_v38  ;;  %2060 = vmatpush3.bf16.msra.mxu1 %v2222_v44  ;;  %v77_v7 = vld [vmem:[%s3397_s0 + $0x190] sm:$0xff]  ;;  %v78_v8 = vld [vmem:[%s3397_s0 + $0x198] sm:$0xff]  ;;  %v102_v9 = vpack.c.bf16 %v50_v3, %v49_v2  ;;  %v79_v10 = vld [vmem:[%s3397_s0 + $0x1a0] sm:$0xff]  ;;  %v103_v12 = vpack.c.bf16 %v52_v6, %v51_v5 }
  0x13   :  { %2061 = vmatprep.subr.bf16.mxu1 %v2223_v49  ;;  %v80_v11 = vld [vmem:[%s3397_s0 + $0x1a8] sm:$0xff]  ;;  %v116_v14 = vpack.c.bf16 %v78_v8, %v77_v7  ;;  %v53_v16 = vld [vmem:[%s3397_s0 + $0xd0] sm:$0xff]  ;;  %v54_v17 = vld [vmem:[%s3397_s0 + $0xd8] sm:$0xff] }
  0x14   :  { %v2227_v13 = vld [vmem:[%s3398_s3 + $0x8] sm:$0xff]   ;;  %v117_v15 = vpack.c.bf16 %v80_v11, %v79_v10  ;;  %v55_v18 = vld [vmem:[%s3397_s0 + $0xe0] sm:$0xff]  ;;  %v81_v20 = vld [vmem:[%s3397_s0 + $0x1b0] sm:$0xff]  ;;  %v104_v22 = vpack.c.bf16 %v54_v17, %v53_v16 }
  0x15   :  { %v56_v19 = vld [vmem:[%s3397_s0 + $0xe8] sm:$0xff]  ;;  %v82_v21 = vld [vmem:[%s3397_s0 + $0x1b8] sm:$0xff]  ;;  %v83_v23 = vld [vmem:[%s3397_s0 + $0x1c0] sm:$0xff] }
  0x16   :  { %2002 = vmatmul.mubr.msk.bf16.gmra.mxu0 %vm138_vm0, %v96_v31  ;;  %2062 = vmatpush3.bf16.msra.mxu1 %v2223_v49  ;;  %v84_v24 = vld [vmem:[%s3397_s0 + $0x1c8] sm:$0xff]  ;;  %v105_v25 = vpack.c.bf16 %v56_v19, %v55_v18  ;;  %v118_v26 = vpack.c.bf16 %v82_v21, %v81_v20  ;;  %v57_v28 = vld [vmem:[%s3397_s0 + $0xf0] sm:$0xff]  ;;  %v58_v29 = vld [vmem:[%s3397_s0 + $0xf8] sm:$0xff] }
  0x17   :  { %2005 = vmatprep.mubr.msk.bf16.mxu0 %vm138_vm0, %v97_v34  ;;  %2063 = vmatprep.subr.bf16.mxu1 %v2224_v54  ;;  %v119_v27 = vpack.c.bf16 %v84_v24, %v83_v23  ;;  %v85_v30 = vld [vmem:[%s3397_s0 + $0x1d0] sm:$0xff]  ;;  %v86_v31 = vld [vmem:[%s3397_s0 + $0x1d8] sm:$0xff]  ;;  %v106_v32 = vpack.c.bf16 %v58_v29, %v57_v28  ;;  %v87_v33 = vld [vmem:[%s3397_s0 + $0x1e0] sm:$0xff] }
  0x18   :  { %v88_v34 = vld [vmem:[%s3397_s0 + $0x1e8] sm:$0xff]  ;;  %v120_v35 = vpack.c.bf16 %v86_v31, %v85_v30  ;;  %v89_v37 = vld [vmem:[%s3397_s0 + $0x1f0] sm:$0xff]  ;;  %v90_v38 = vld [vmem:[%s3397_s0 + $0x1f8] sm:$0xff] }
  0x19   :  { %2034 = vmatmul.mubr.msk.bf16.gmra.mxu1 %vm138_vm0, %v112_v50  ;;  %v121_v36 = vpack.c.bf16 %v88_v34, %v87_v33  ;;  %v122_v39 = vpack.c.bf16 %v90_v38, %v89_v37  ;;  %v2228_v40 = vld [vmem:[%s3398_s3] sm:$0xff]   ;;  %v2229_v50 = vld [vmem:[%s3400_s5 + $0x38] sm:$0xff]   ;;  %v2230_v53 = vld [vmem:[%s3400_s5 + $0x30] sm:$0xff]  }
  0x1a   :  { %2037 = vmatprep.mubr.msk.bf16.mxu1 %vm138_vm0, %v113_v51  ;;  %2064 = vmatpush3.bf16.msra.mxu1 %v2224_v54  ;;  %v2532_v43 = vld [vmem:[%s3399_s2] ss:$0 sm:$0xff]  ;;  %v2231_v60 = vld [vmem:[%s3400_s5 + $0x28] sm:$0xff]   ;;  %v2233_v16 = vld [vmem:[%s3400_s5 + $0x18] sm:$0xff]  }
  0x1b   :  { %2065 = vmatprep.subr.bf16.mxu1 %v2225_v63  ;;  %2137 = vmatprep.subr.bf16.mxu0 %v2229_v50  ;;  %v2232_v6 = vld [vmem:[%s3400_s5 + $0x20] sm:$0xff]  }
  0x1c   :  { %2138 = vmatpush3.bf16.msra.mxu0 %v2229_v50 }
  0x1d   :  { %2139 = vmatprep.subr.bf16.mxu0 %v2230_v53 }
  0x1e   :  { %2006 = vmatmul.mubr.msk.bf16.gmra.mxu0 %vm138_vm0, %v98_v46  ;;  %2066 = vmatpush3.bf16.msra.mxu1 %v2225_v63 }
  0x1f   :  { %2009 = vmatprep.mubr.msk.bf16.mxu0 %vm138_vm0, %v99_v48  ;;  %2067 = vmatprep.subr.bf16.mxu1 %v2226_v4 }
  0x20   :  { %2140 = vmatpush3.bf16.msra.mxu0 %v2230_v53 }
  0x21   :  { %2038 = vmatmul.mubr.msk.bf16.gmra.mxu1 %vm138_vm0, %v114_v0  ;;  %2141 = vmatprep.subr.bf16.mxu0 %v2231_v60 }
  0x22   :  { %2041 = vmatprep.mubr.msk.bf16.mxu1 %vm138_vm0, %v115_v1  ;;  %2068 = vmatpush3.bf16.msra.mxu1 %v2226_v4 }
  0x23   :  { %2069 = vmatprep.subr.bf16.mxu1 %v2227_v13 }
  0x24   :  { %2142 = vmatpush3.bf16.msra.mxu0 %v2231_v60 }
  0x25   :  { %2143 = vmatprep.subr.bf16.mxu0 %v2232_v6 }
  0x26   :  { %2010 = vmatmul.mubr.msk.bf16.gmra.mxu0 %vm138_vm0, %v100_v59  ;;  %2070 = vmatpush3.bf16.msra.mxu1 %v2227_v13 }
  0x27   :  { %2013 = vmatprep.mubr.msk.bf16.mxu0 %vm138_vm0, %v101_v62  ;;  %2071 = vmatprep.subr.bf16.mxu1 %v2228_v40 }
  0x28   :  { %2144 = vmatpush3.bf16.msra.mxu0 %v2232_v6 }
  0x29   :  { %2042 = vmatmul.mubr.msk.bf16.gmra.mxu1 %vm138_vm0, %v116_v14  ;;  %2145 = vmatprep.subr.bf16.mxu0 %v2233_v16 }
  0x2a   :  { %2045 = vmatprep.mubr.msk.bf16.mxu1 %vm138_vm0, %v117_v15  ;;  %2072 = vmatpush3.bf16.msra.mxu1 %v2228_v40 }
  0x2c   :  { %2146 = vmatpush3.bf16.msra.mxu0 %v2233_v16 }
  0x2e   :  { %2014 = vmatmul.mubr.msk.bf16.gmra.mxu0 %vm138_vm0, %v102_v9 }
  0x2f   :  { %2017 = vmatprep.mubr.msk.bf16.mxu0 %vm138_vm0, %v103_v12 }
  0x31   :  { %2046 = vmatmul.mubr.msk.bf16.gmra.mxu1 %vm138_vm0, %v118_v26  ;;  %v2234_v26 = vld [vmem:[%s3400_s5 + $0x10] sm:$0xff]  }
  0x32   :  { %2049 = vmatprep.mubr.msk.bf16.mxu1 %vm138_vm0, %v119_v27  ;;  %2147 = vmatprep.subr.bf16.mxu0 %v2234_v26 }
  0x33   :  { %2148 = vmatpush3.bf16.msra.mxu0 %v2234_v26 }
  0x36   :  { %2018 = vmatmul.mubr.msk.bf16.gmra.mxu0 %vm138_vm0, %v104_v22 }
  0x37   :  { %2021 = vmatprep.mubr.msk.bf16.mxu0 %vm138_vm0, %v105_v25 }
  0x39   :  { %2050 = vmatmul.mubr.msk.bf16.gmra.mxu1 %vm138_vm0, %v120_v35 }
  0x3a   :  { %2053 = vmatprep.mubr.msk.bf16.mxu1 %vm138_vm0, %v121_v36  ;;  %v2235_v36 = vld [vmem:[%s3400_s5 + $0x8] sm:$0xff]  }
  0x3b   :  { %2149 = vmatprep.subr.bf16.mxu0 %v2235_v36 }
  0x3c   :  { %2150 = vmatpush3.bf16.msra.mxu0 %v2235_v36 }
  0x3e   :  { %2022 = vmatmul.mubr.msk.bf16.gmra.mxu0 %vm138_vm0, %v106_v32 }
  0x41   :  { %2054 = vmatmul.mubr.msk.bf16.gmra.mxu1 %vm138_vm0, %v122_v39 }
  0xc6   :  { %v1995_v41 = vpop.f32.mrf.mxu0 }
  0xc7   :  { %v278_v47 = vadd.f32 %v1995_v41, %v2532_v43 }
  0xc8   :  { %v269_v42 = vpop.f32.mrf.mxu0 }
  0xc9   :  { %v270_v45 = vadd.f32 %v2532_v43, %v269_v42  ;;  %v526_v56 = vmax.f32 %v278_v47, 0.0  ;;  %v2544_v58 = vpop.f32.mrf.mxu1 }
  0xca   :  { %v1996_v44 = vpop.f32.mrf.mxu0 }
  0xcb   :  { %v281_v46 = vadd.f32 %v1996_v44, %v2532_v43  ;;  %v524_v54 = vmax.f32 %v270_v45, 0.0  ;;  %v2549_v63 = vpop.f32.mrf.mxu1 }
  0xcc   :  { %v272_v48 = vpop.f32.mrf.mxu0 }
  0xcd   :  { %v273_v49 = vadd.f32 %v2532_v43, %v272_v48  ;;  %v527_v51 = vmax.f32 %v281_v46, 0.0  ;;  %v2554_v4 = vpop.f32.mrf.mxu1 }
  0xce   :  { %v1999_v52 = vpop.f32.mrf.mxu0 }
  0xcf   :  { %v525_v55 = vmax.f32 %v273_v49, 0.0  ;;  %v589_v61 = vpack.c.bf16 %v527_v51, %v526_v56  ;;  %v294_v2 = vadd.f32 %v1999_v52, %v2532_v43  ;;  %v2560_v9 = vpop.f32.mrf.mxu1 }
  0xd0   :  { %v285_v57 = vpop.f32.mrf.mxu0 }
  0xd1   :  { %v588_v59 = vpack.c.bf16 %v525_v55, %v524_v54  ;;  %v286_v0 = vadd.f32 %v2532_v43, %v285_v57  ;;  %v530_v12 = vmax.f32 %v294_v2, 0.0  ;;  %v2562_v14 = vpop.f32.mrf.mxu1 }
  0xd2   :  { %v2000_v62 = vpop.f32.mrf.mxu0 }
  0xd3   :  { %v297_v1 = vadd.f32 %v2000_v62, %v2532_v43  ;;  %2073 = vmatprep.mubr.bf16.mxu1 %v588_v59  ;;  %v528_v10 = vmax.f32 %v286_v0, 0.0  ;;  %v2567_v19 = vpop.f32.mrf.mxu1 }
  0xd4   :  { %v288_v3 = vpop.f32.mrf.mxu0  ;;  %2074 = vmatmul.mubr.bf16.vlgmr.msra.gmra.mxu1 %v589_v61 }
  0xd5   :  { %v289_v5 = vadd.f32 %v2532_v43, %v288_v3  ;;  %v531_v7 = vmax.f32 %v297_v1, 0.0  ;;  %v2572_v24 = vpop.f32.mrf.mxu1 }
  0xd6   :  { %v2003_v8 = vpop.f32.mrf.mxu0 }
  0xd7   :  { %v529_v11 = vmax.f32 %v289_v5, 0.0  ;;  %v591_v17 = vpack.c.bf16 %v531_v7, %v530_v12  ;;  %v310_v22 = vadd.f32 %v2003_v8, %v2532_v43  ;;  %v2578_v29 = vpop.f32.mrf.mxu1 }
  0xd8   :  { %v301_v13 = vpop.f32.mrf.mxu0 }
  0xd9   :  { %v590_v15 = vpack.c.bf16 %v529_v11, %v528_v10  ;;  %v302_v20 = vadd.f32 %v2532_v43, %v301_v13  ;;  %v534_v32 = vmax.f32 %v310_v22, 0.0  ;;  %v2580_v34 = vpop.f32.mrf.mxu1 }
  0xda   :  { %v2004_v18 = vpop.f32.mrf.mxu0 }
  0xdb   :  { %v313_v21 = vadd.f32 %v2004_v18, %v2532_v43  ;;  %2077 = vmatprep.mubr.bf16.mxu1 %v590_v15  ;;  %v532_v30 = vmax.f32 %v302_v20, 0.0  ;;  %v2585_v39 = vpop.f32.mrf.mxu1 }
  0xdc   :  { %v304_v23 = vpop.f32.mrf.mxu0  ;;  %2078 = vmatmul.mubr.bf16.gmra.mxu1 %v591_v17 }
  0xdd   :  { %v305_v25 = vadd.f32 %v2532_v43, %v304_v23  ;;  %v535_v27 = vmax.f32 %v313_v21, 0.0  ;;  %v2590_v45 = vpop.f32.mrf.mxu1 }
  0xde   :  { %v2007_v28 = vpop.f32.mrf.mxu0 }
  0xdf   :  { %v533_v31 = vmax.f32 %v305_v25, 0.0  ;;  %v593_v37 = vpack.c.bf16 %v535_v27, %v534_v32  ;;  %v326_v42 = vadd.f32 %v2007_v28, %v2532_v43  ;;  %v2593_v49 = vpop.f32.mrf.mxu1 }
  0xe0   :  { %v317_v33 = vpop.f32.mrf.mxu0 }
  0xe1   :  { %v592_v35 = vpack.c.bf16 %v533_v31, %v532_v30  ;;  %v318_v40 = vadd.f32 %v2532_v43, %v317_v33  ;;  %v538_v52 = vmax.f32 %v326_v42, 0.0  ;;  %v2595_v57 = vpop.f32.mrf.mxu1 }
  0xe2   :  { %v2008_v38 = vpop.f32.mrf.mxu0 }
  0xe3   :  { %v329_v41 = vadd.f32 %v2008_v38, %v2532_v43  ;;  %2081 = vmatprep.mubr.bf16.mxu1 %v592_v35  ;;  %v536_v50 = vmax.f32 %v318_v40, 0.0  ;;  %v2601_v3 = vpop.f32.mrf.mxu1 }
  0xe4   :  { %v320_v44 = vpop.f32.mrf.mxu0  ;;  %2082 = vmatmul.mubr.bf16.gmra.mxu1 %v593_v37 }
  0xe5   :  { %v321_v46 = vadd.f32 %v2532_v43, %v320_v44  ;;  %v539_v47 = vmax.f32 %v329_v41, 0.0  ;;  %v2603_v13 = vpop.f32.mrf.mxu1 }
  0xe6   :  { %v2011_v48 = vpop.f32.mrf.mxu0 }
  0xe7   :  { %v537_v51 = vmax.f32 %v321_v46, 0.0  ;;  %v595_v55 = vpack.c.bf16 %v539_v47, %v538_v52  ;;  %v342_v61 = vadd.f32 %v2011_v48, %v2532_v43  ;;  %v2609_v23 = vpop.f32.mrf.mxu1  ;;  %v398_v52 = vadd.f32 %v2532_v43, %v2549_v63 }
  0xe8   :  { %v333_v53 = vpop.f32.mrf.mxu0 }
  0xe9   :  { %v594_v54 = vpack.c.bf16 %v537_v51, %v536_v50  ;;  %v334_v59 = vadd.f32 %v2532_v43, %v333_v53  ;;  %v542_v7 = vmax.f32 %v342_v61, 0.0  ;;  %v2611_v33 = vpop.f32.mrf.mxu1  ;;  %v401_v53 = vadd.f32 %v2532_v43, %v2560_v9 }
  0xea   :  { %v2012_v56 = vpop.f32.mrf.mxu0 }
  0xeb   :  { %v345_v60 = vadd.f32 %v2012_v56, %v2532_v43  ;;  %2085 = vmatprep.mubr.bf16.mxu1 %v594_v54  ;;  %v540_v5 = vmax.f32 %v334_v59, 0.0  ;;  %v2617_v44 = vpop.f32.mrf.mxu1  ;;  %v557_v63 = vmax.f32 %v401_v53, 0.0  ;;  %v457_v53 = vadd.f32 %v2603_v13, %v2532_v43 }
  0xec   :  { %v336_v62 = vpop.f32.mrf.mxu0  ;;  %2086 = vmatmul.mubr.bf16.gmra.mxu1 %v595_v55 }
  0xed   :  { %v337_v0 = vadd.f32 %v2532_v43, %v336_v62  ;;  %v543_v1 = vmax.f32 %v345_v60, 0.0  ;;  %v2623_v56 = vpop.f32.mrf.mxu1 }
  0xee   :  { %v2015_v2 = vpop.f32.mrf.mxu0  ;;  %v473_v13 = vadd.f32 %v2623_v56, %v2532_v43 }
  0xef   :  { %v541_v6 = vmax.f32 %v337_v0, 0.0  ;;  %v597_v11 = vpack.c.bf16 %v543_v1, %v542_v7  ;;  %v358_v17 = vadd.f32 %v2015_v2, %v2532_v43  ;;  %v556_v0 = vmax.f32 %v398_v52, 0.0 }
  0xf0   :  { %v349_v8 = vpop.f32.mrf.mxu0  ;;  %v454_v52 = vadd.f32 %v2595_v57, %v2532_v43  ;;  %v470_v57 = vadd.f32 %v2611_v33, %v2532_v43 }
  0xf1   :  { %v596_v10 = vpack.c.bf16 %v541_v6, %v540_v5  ;;  %v350_v15 = vadd.f32 %v2532_v43, %v349_v8  ;;  %v546_v27 = vmax.f32 %v358_v17, 0.0  ;;  %v464_v5 = vpop.f32.mrf.mxu1  ;;  %v409_v17 = vadd.f32 %v2554_v4, %v2532_v43 }
  0xf2   :  { %v2016_v12 = vpop.f32.mrf.mxu0  ;;  %v422_v4 = vadd.f32 %v2562_v14, %v2532_v43  ;;  %v438_v14 = vadd.f32 %v2580_v34, %v2532_v43  ;;  %v462_v34 = vadd.f32 %v2532_v43, %v2617_v44 }
  0xf3   :  { %v361_v16 = vadd.f32 %v2016_v12, %v2532_v43  ;;  %2089 = vmatprep.mubr.bf16.mxu1 %v596_v10  ;;  %v544_v25 = vmax.f32 %v350_v15, 0.0  ;;  %v604_v10 = vpack.c.bf16 %v557_v63, %v556_v0  ;;  %v417_v12 = vadd.f32 %v2532_v43, %v2578_v29 }
  0xf4   :  { %v352_v18 = vpop.f32.mrf.mxu0  ;;  %2090 = vmatmul.mubr.bf16.gmra.mxu1 %v597_v11  ;;  %v414_v11 = vadd.f32 %v2532_v43, %v2567_v19  ;;  %v406_v15 = vadd.f32 %v2544_v58, %v2532_v43  ;;  %v430_v29 = vadd.f32 %v2532_v43, %v2585_v39  ;;  %v433_v58 = vadd.f32 %v2532_v43, %v2593_v49 }
  0xf5   :  { %v353_v20 = vadd.f32 %v2532_v43, %v352_v18  ;;  %v547_v21 = vmax.f32 %v361_v16, 0.0  ;;  %v2637_v18 = vpop.f32.mrf.mxu1  ;;  %v446_v39 = vadd.f32 %v2532_v43, %v2601_v3  ;;  %v449_v49 = vadd.f32 %v2532_v43, %v2609_v23 }
  0xf6   :  { %v2019_v22 = vpop.f32.mrf.mxu0  ;;  %v566_v3 = vmax.f32 %v438_v14, 0.0  ;;  %v486_v33 = vadd.f32 %v2637_v18, %v2532_v43 }
  0xf7   :  { %v545_v26 = vmax.f32 %v353_v20, 0.0  ;;  %v599_v31 = vpack.c.bf16 %v547_v21, %v546_v27  ;;  %v374_v37 = vadd.f32 %v2019_v22, %v2532_v43  ;;  %v560_v20 = vmax.f32 %v414_v11, 0.0  ;;  %v477_v19 = vpop.f32.mrf.mxu1 }
  0xf8   :  { %v365_v28 = vpop.f32.mrf.mxu0  ;;  %v561_v21 = vmax.f32 %v417_v12, 0.0  ;;  %v558_v22 = vmax.f32 %v406_v15, 0.0  ;;  %v478_v44 = vadd.f32 %v2532_v43, %v477_v19 }
  0xf9   :  { %v598_v30 = vpack.c.bf16 %v545_v26, %v544_v25  ;;  %v366_v35 = vadd.f32 %v2532_v43, %v365_v28  ;;  %v550_v48 = vmax.f32 %v374_v37, 0.0  ;;  %v559_v25 = vmax.f32 %v409_v17, 0.0 }
  0xfa   :  { %v2020_v32 = vpop.f32.mrf.mxu0  ;;  %v606_v26 = vpack.c.bf16 %v561_v21, %v560_v20  ;;  %v425_v28 = vadd.f32 %v2572_v24, %v2532_v43  ;;  %v441_v24 = vadd.f32 %v2590_v45, %v2532_v43  ;;  %v465_v45 = vadd.f32 %v2532_v43, %v464_v5 }
  0xfb   :  { %v377_v36 = vadd.f32 %v2020_v32, %v2532_v43  ;;  %2093 = vmatprep.mubr.bf16.mxu1 %v598_v30  ;;  %v548_v46 = vmax.f32 %v366_v35, 0.0  ;;  %v605_v27 = vpack.c.bf16 %v559_v25, %v558_v22  ;;  %v2048_v30 = vpop.f32.mrf.mxu1  ;;  %v565_v32 = vmax.f32 %v433_v58, 0.0 }
  0xfc   :  { %v368_v38 = vpop.f32.mrf.mxu0  ;;  %2094 = vmatmul.mubr.bf16.gmra.mxu1 %v599_v31  ;;  %v564_v31 = vmax.f32 %v430_v29, 0.0  ;;  %v562_v35 = vmax.f32 %v422_v4, 0.0  ;;  %v576_v5 = vmax.f32 %v478_v44, 0.0  ;;  %v578_v21 = vmax.f32 %v486_v33, 0.0 }
  0xfd   :  { %v369_v40 = vadd.f32 %v2532_v43, %v368_v38  ;;  %v551_v41 = vmax.f32 %v377_v36, 0.0  ;;  %v563_v36 = vmax.f32 %v425_v28, 0.0  ;;  %v480_v37 = vpop.f32.mrf.mxu1 }
  0xfe   :  { %v2023_v42 = vpop.f32.mrf.mxu0  ;;  %v608_v38 = vpack.c.bf16 %v565_v32, %v564_v31 }
  0xff   :  { %v549_v47 = vmax.f32 %v369_v40, 0.0  ;;  %v601_v54 = vpack.c.bf16 %v551_v41, %v550_v48  ;;  %v390_v61 = vadd.f32 %v2023_v42, %v2532_v43  ;;  %v607_v40 = vpack.c.bf16 %v563_v36, %v562_v35  ;;  %v2051_v41 = vpop.f32.mrf.mxu1  ;;  %v2236_v42 = vld [vmem:[%s3400_s5] sm:$0xff]  }
 0x100   :  { %v381_v50 = vpop.f32.mrf.mxu0  ;;  %v567_v48 = vmax.f32 %v441_v24, 0.0  ;;  %2151 = vmatprep.subr.bf16.mxu0 %v2236_v42 }
 0x101   :  { %v600_v51 = vpack.c.bf16 %v549_v47, %v548_v46  ;;  %v382_v59 = vadd.f32 %v2532_v43, %v381_v50  ;;  %v554_v7 = vmax.f32 %v390_v61, 0.0  ;;  %v568_v46 = vmax.f32 %v446_v39, 0.0  ;;  %v493_v50 = vpop.f32.mrf.mxu1  ;;  %2152 = vmatpush3.bf16.msra.mxu0 %v2236_v42 }
 0x102   :  { %v2024_v55 = vpop.f32.mrf.mxu0  ;;  %v569_v47 = vmax.f32 %v449_v49, 0.0  ;;  %v571_v61 = vmax.f32 %v457_v53, 0.0  ;;  %v494_v11 = vadd.f32 %v2532_v43, %v493_v50 }
 0x103   :  { %v393_v60 = vadd.f32 %v2024_v55, %v2532_v43  ;;  %2097 = vmatprep.mubr.bf16.mxu1 %v600_v51  ;;  %v552_v9 = vmax.f32 %v382_v59, 0.0  ;;  %v609_v51 = vpack.c.bf16 %v567_v48, %v566_v3  ;;  %v572_v55 = vmax.f32 %v462_v34, 0.0 }
 0x104   :  { %v384_v62 = vpop.f32.mrf.mxu0  ;;  %2098 = vmatmul.mubr.bf16.gmra.mxu1 %v601_v54  ;;  %v610_v23 = vpack.c.bf16 %v569_v47, %v568_v46  ;;  %v2052_v54 = vpop.f32.mrf.mxu1  ;;  %v573_v59 = vmax.f32 %v465_v45, 0.0  ;;  %v580_v17 = vmax.f32 %v494_v11, 0.0 }
 0x105   :  { %v385_v1 = vadd.f32 %v2532_v43, %v384_v62  ;;  %v555_v2 = vmax.f32 %v393_v60, 0.0  ;;  %v570_v60 = vmax.f32 %v454_v52, 0.0  ;;  %v505_v18 = vadd.f32 %v2052_v54, %v2532_v43 }
 0x106   :  { %v496_v62 = vpop.f32.mrf.mxu1  ;;  %v612_v0 = vpack.c.bf16 %v573_v59, %v572_v55 }
 0x107   :  { %v553_v6 = vmax.f32 %v385_v1, 0.0  ;;  %v603_v16 = vpack.c.bf16 %v555_v2, %v554_v7  ;;  %v481_v1 = vadd.f32 %v2532_v43, %v480_v37  ;;  %v611_v63 = vpack.c.bf16 %v571_v61, %v570_v60 }
 0x108   :  { %v2055_v2 = vpop.f32.mrf.mxu1  ;;  %v575_v7 = vmax.f32 %v473_v13, 0.0  ;;  %v497_v12 = vadd.f32 %v2532_v43, %v496_v62  ;;  %v583_v31 = vmax.f32 %v505_v18, 0.0 }
 0x109   :  { %v602_v8 = vpack.c.bf16 %v553_v6, %v552_v9  ;;  %v577_v9 = vmax.f32 %v481_v1, 0.0  ;;  %v574_v6 = vmax.f32 %v470_v57, 0.0  ;;  %v518_v36 = vadd.f32 %v2055_v2, %v2532_v43 }
 0x10a   :  { %v581_v20 = vmax.f32 %v497_v12, 0.0 }
 0x10b   :  { %2101 = vmatprep.mubr.bf16.mxu1 %v602_v8  ;;  %v509_v8 = vpop.f32.mrf.mxu1  ;;  %v613_v15 = vpack.c.bf16 %v575_v7, %v574_v6 }
 0x10c   :  { %2102 = vmatmul.mubr.bf16.gmra.mxu1 %v603_v16  ;;  %v489_v16 = vadd.f32 %v2048_v30, %v2532_v43  ;;  %v616_v19 = vpack.c.bf16 %v581_v20, %v580_v17 }
 0x10d   :  { %2105 = vmatprep.mubr.bf16.mxu1 %v604_v10  ;;  %v614_v10 = vpack.c.bf16 %v577_v9, %v576_v5  ;;  %v2056_v56 = vpop.f32.mrf.mxu1 }
 0x10e   :  { %v579_v22 = vmax.f32 %v489_v16, 0.0  ;;  %v521_v37 = vadd.f32 %v2056_v56, %v2532_v43 }
 0x10f   :  { %v512_v25 = vpop.f32.mrf.mxu1 }
 0x110   :  { %v513_v29 = vadd.f32 %v2532_v43, %v512_v25  ;;  %v615_v58 = vpack.c.bf16 %v579_v22, %v578_v21  ;;  %v587_v39 = vmax.f32 %v521_v37, 0.0 }
 0x112   :  { %v585_v28 = vmax.f32 %v513_v29, 0.0 }
 0x114   :  { %2106 = vmatmul.mubr.bf16.gmra.mxu1 %v605_v27  ;;  %v502_v27 = vadd.f32 %v2051_v41, %v2532_v43 }
 0x115   :  { %2109 = vmatprep.mubr.bf16.mxu1 %v606_v26  ;;  %v510_v26 = vadd.f32 %v2532_v43, %v509_v8 }
 0x116   :  { %v582_v30 = vmax.f32 %v502_v27, 0.0 }
 0x117   :  { %v584_v4 = vmax.f32 %v510_v26, 0.0 }
 0x118   :  { %v617_v35 = vpack.c.bf16 %v583_v31, %v582_v30 }
 0x119   :  { %v618_v32 = vpack.c.bf16 %v585_v28, %v584_v4 }
 0x11c   :  { %2110 = vmatmul.mubr.bf16.gmra.mxu1 %v607_v40  ;;  %v2685_v40 = vld [vmem:[%s3401_s4] ss:$0 sm:$0xff] }
 0x11d   :  { %2113 = vmatprep.mubr.bf16.mxu1 %v608_v38  ;;  %v586_v38 = vmax.f32 %v518_v36, 0.0 }
 0x11f   :  { %v619_v49 = vpack.c.bf16 %v587_v39, %v586_v38 }
 0x124   :  { %2114 = vmatmul.mubr.bf16.gmra.mxu1 %v609_v51 }
 0x125   :  { %2117 = vmatprep.mubr.bf16.mxu1 %v610_v23 }
 0x12c   :  { %2118 = vmatmul.mubr.bf16.gmra.mxu1 %v611_v63 }
 0x12d   :  { %2121 = vmatprep.mubr.bf16.mxu1 %v612_v0 }
 0x134   :  { %2122 = vmatmul.mubr.bf16.gmra.mxu1 %v613_v15 }
 0x135   :  { %2125 = vmatprep.mubr.bf16.mxu1 %v614_v10 }
 0x13c   :  { %2126 = vmatmul.mubr.bf16.gmra.mxu1 %v615_v58 }
 0x13d   :  { %2129 = vmatprep.mubr.bf16.mxu1 %v616_v19 }
 0x144   :  { %2130 = vmatmul.mubr.bf16.gmra.mxu1 %v617_v35 }
 0x145   :  { %2133 = vmatprep.mubr.bf16.mxu1 %v618_v32 }
 0x14c   :  { %2134 = vmatmul.mubr.bf16.gmra.mxu1 %v619_v49 }
 0x194   :  { %v2075_v14 = vpop.f32.mrf.mxu1 }
 0x195   :  { %v734_v24 = vadd.f32 %v2075_v14, %v2685_v40 }
 0x196   :  { %v725_v41 = vpop.f32.mrf.mxu1 }
 0x197   :  { %1439 = vst.msk [vmem:[%s3402_s7 + $0x10] sm:$0xff] %vm1436_vm1, %v734_v24  ;;  %v726_v43 = vadd.f32 %v2685_v40, %v725_v41  ;;  %v982_v51 = vmax.f32 %v734_v24, 0.0 }
 0x198   :  { %v2076_v42 = vpop.f32.mrf.mxu1 }
 0x199   :  { %1437 = vst.msk [vmem:[%s3402_s7] sm:$0xff] %vm1436_vm1, %v726_v43  ;;  %v737_v46 = vadd.f32 %v2076_v42, %v2685_v40  ;;  %v980_v23 = vmax.f32 %v726_v43, 0.0 }
 0x19a   :  { %v728_v47 = vpop.f32.mrf.mxu1 }
 0x19b   :  { %1440 = vst.msk [vmem:[%s3402_s7 + $0x18] sm:$0xff] %vm1436_vm1, %v737_v46  ;;  %v729_v3 = vadd.f32 %v2685_v40, %v728_v47  ;;  %v983_v48 = vmax.f32 %v737_v46, 0.0 }
 0x19c   :  { %v2079_v50 = vpop.f32.mrf.mxu1 }
 0x19d   :  { %v981_v34 = vmax.f32 %v729_v3, 0.0  ;;  %1438 = vst.msk [vmem:[%s3402_s7 + $0x8] sm:$0xff] %vm1436_vm1, %v729_v3  ;;  %v750_v45 = vadd.f32 %v2079_v50, %v2685_v40  ;;  %v1045_v55 = vpack.c.bf16 %v983_v48, %v982_v51 }
 0x19e   :  { %v741_v52 = vpop.f32.mrf.mxu1 }
 0x19f   :  { %1443 = vst.msk [vmem:[%s3402_s7 + $0x30] sm:$0xff] %vm1436_vm1, %v750_v45  ;;  %v742_v53 = vadd.f32 %v2685_v40, %v741_v52  ;;  %v1044_v54 = vpack.c.bf16 %v981_v34, %v980_v23  ;;  %v986_v13 = vmax.f32 %v750_v45, 0.0 }
 0x1a0   :  { %v2080_v59 = vpop.f32.mrf.mxu1 }
 0x1a1   :  { %1441 = vst.msk [vmem:[%s3402_s7 + $0x20] sm:$0xff] %vm1436_vm1, %v742_v53  ;;  %v753_v60 = vadd.f32 %v2080_v59, %v2685_v40  ;;  %2153 = vmatprep.mubr.bf16.mxu0 %v1044_v54  ;;  %v984_v1 = vmax.f32 %v742_v53, 0.0 }
 0x1a2   :  { %v744_v61 = vpop.f32.mrf.mxu1  ;;  %2154 = vmatmul.mubr.bf16.vlgmr.msra.gmra.mxu0 %v1045_v55 }
 0x1a3   :  { %1444 = vst.msk [vmem:[%s3402_s7 + $0x38] sm:$0xff] %vm1436_vm1, %v753_v60  ;;  %v745_v62 = vadd.f32 %v2685_v40, %v744_v61  ;;  %v987_v0 = vmax.f32 %v753_v60, 0.0 }
 0x1a4   :  { %v2083_v44 = vpop.f32.mrf.mxu1 }
 0x1a5   :  { %v985_v63 = vmax.f32 %v745_v62, 0.0  ;;  %1442 = vst.msk [vmem:[%s3402_s7 + $0x28] sm:$0xff] %vm1436_vm1, %v745_v62  ;;  %v766_v57 = vadd.f32 %v2083_v44, %v2685_v40  ;;  %v1047_v7 = vpack.c.bf16 %v987_v0, %v986_v13 }
 0x1a6   :  { %v757_v2 = vpop.f32.mrf.mxu1 }
 0x1a7   :  { %1447 = vst.msk [vmem:[%s3402_s7 + $0x50] sm:$0xff] %vm1436_vm1, %v766_v57  ;;  %v758_v5 = vadd.f32 %v2685_v40, %v757_v2  ;;  %v1046_v9 = vpack.c.bf16 %v985_v63, %v984_v1  ;;  %v990_v17 = vmax.f32 %v766_v57, 0.0 }
 0x1a8   :  { %v2084_v6 = vpop.f32.mrf.mxu1 }
 0x1a9   :  { %1445 = vst.msk [vmem:[%s3402_s7 + $0x40] sm:$0xff] %vm1436_vm1, %v758_v5  ;;  %v769_v8 = vadd.f32 %v2084_v6, %v2685_v40  ;;  %2157 = vmatprep.mubr.bf16.mxu0 %v1046_v9  ;;  %v988_v33 = vmax.f32 %v758_v5, 0.0 }
 0x1aa   :  { %v760_v10 = vpop.f32.mrf.mxu1  ;;  %2158 = vmatmul.mubr.bf16.gmra.mxu0 %v1047_v7 }
 0x1ab   :  { %1448 = vst.msk [vmem:[%s3402_s7 + $0x58] sm:$0xff] %vm1436_vm1, %v769_v8  ;;  %v761_v11 = vadd.f32 %v2685_v40, %v760_v10  ;;  %v991_v12 = vmax.f32 %v769_v8, 0.0 }
 0x1ac   :  { %v2087_v15 = vpop.f32.mrf.mxu1 }
 0x1ad   :  { %v989_v16 = vmax.f32 %v761_v11, 0.0  ;;  %1446 = vst.msk [vmem:[%s3402_s7 + $0x48] sm:$0xff] %vm1436_vm1, %v761_v11  ;;  %v782_v56 = vadd.f32 %v2087_v15, %v2685_v40  ;;  %v1049_v19 = vpack.c.bf16 %v991_v12, %v990_v17 }
 0x1ae   :  { %v773_v20 = vpop.f32.mrf.mxu1 }
 0x1af   :  { %1451 = vst.msk [vmem:[%s3402_s7 + $0x70] sm:$0xff] %vm1436_vm1, %v782_v56  ;;  %v774_v21 = vadd.f32 %v2685_v40, %v773_v20  ;;  %v1048_v22 = vpack.c.bf16 %v989_v16, %v988_v33  ;;  %v994_v31 = vmax.f32 %v782_v56, 0.0 }
 0x1b0   :  { %v2088_v25 = vpop.f32.mrf.mxu1 }
 0x1b1   :  { %1449 = vst.msk [vmem:[%s3402_s7 + $0x60] sm:$0xff] %vm1436_vm1, %v774_v21  ;;  %v785_v26 = vadd.f32 %v2088_v25, %v2685_v40  ;;  %2161 = vmatprep.mubr.bf16.mxu0 %v1048_v22  ;;  %v992_v4 = vmax.f32 %v774_v21, 0.0 }
 0x1b2   :  { %v776_v29 = vpop.f32.mrf.mxu1  ;;  %2162 = vmatmul.mubr.bf16.gmra.mxu0 %v1049_v19 }
 0x1b3   :  { %1452 = vst.msk [vmem:[%s3402_s7 + $0x78] sm:$0xff] %vm1436_vm1, %v785_v26  ;;  %v777_v58 = vadd.f32 %v2685_v40, %v776_v29  ;;  %v995_v27 = vmax.f32 %v785_v26, 0.0 }
 0x1b4   :  { %v2091_v18 = vpop.f32.mrf.mxu1 }
 0x1b5   :  { %v993_v28 = vmax.f32 %v777_v58, 0.0  ;;  %1450 = vst.msk [vmem:[%s3402_s7 + $0x68] sm:$0xff] %vm1436_vm1, %v777_v58  ;;  %v798_v30 = vadd.f32 %v2091_v18, %v2685_v40  ;;  %v1051_v38 = vpack.c.bf16 %v995_v27, %v994_v31 }
 0x1b6   :  { %v789_v32 = vpop.f32.mrf.mxu1 }
 0x1b7   :  { %1455 = vst.msk [vmem:[%s3402_s7 + $0x90] sm:$0xff] %vm1436_vm1, %v798_v30  ;;  %v790_v35 = vadd.f32 %v2685_v40, %v789_v32  ;;  %v1050_v36 = vpack.c.bf16 %v993_v28, %v992_v4  ;;  %v998_v47 = vmax.f32 %v798_v30, 0.0 }
 0x1b8   :  { %v2092_v37 = vpop.f32.mrf.mxu1 }
 0x1b9   :  { %1453 = vst.msk [vmem:[%s3402_s7 + $0x80] sm:$0xff] %vm1436_vm1, %v790_v35  ;;  %v801_v39 = vadd.f32 %v2092_v37, %v2685_v40  ;;  %2165 = vmatprep.mubr.bf16.mxu0 %v1050_v36  ;;  %v996_v43 = vmax.f32 %v790_v35, 0.0 }
 0x1ba   :  { %v792_v49 = vpop.f32.mrf.mxu1  ;;  %2166 = vmatmul.mubr.bf16.gmra.mxu0 %v1051_v38 }
 0x1bb   :  { %1456 = vst.msk [vmem:[%s3402_s7 + $0x98] sm:$0xff] %vm1436_vm1, %v801_v39  ;;  %v793_v14 = vadd.f32 %v2685_v40, %v792_v49  ;;  %v999_v24 = vmax.f32 %v801_v39, 0.0 }
 0x1bc   :  { %v2095_v41 = vpop.f32.mrf.mxu1 }
 0x1bd   :  { %v997_v42 = vmax.f32 %v793_v14, 0.0  ;;  %1454 = vst.msk [vmem:[%s3402_s7 + $0x88] sm:$0xff] %vm1436_vm1, %v793_v14  ;;  %v814_v46 = vadd.f32 %v2095_v41, %v2685_v40  ;;  %v1053_v34 = vpack.c.bf16 %v999_v24, %v998_v47 }
 0x1be   :  { %v805_v3 = vpop.f32.mrf.mxu1 }
 0x1bf   :  { %1459 = vst.msk [vmem:[%s3402_s7 + $0xb0] sm:$0xff] %vm1436_vm1, %v814_v46  ;;  %v806_v48 = vadd.f32 %v2685_v40, %v805_v3  ;;  %v1052_v50 = vpack.c.bf16 %v997_v42, %v996_v43  ;;  %v1002_v61 = vmax.f32 %v814_v46, 0.0 }
 0x1c0   :  { %v2096_v23 = vpop.f32.mrf.mxu1 }
 0x1c1   :  { %1457 = vst.msk [vmem:[%s3402_s7 + $0xa0] sm:$0xff] %vm1436_vm1, %v806_v48  ;;  %v817_v45 = vadd.f32 %v2096_v23, %v2685_v40  ;;  %2169 = vmatprep.mubr.bf16.mxu0 %v1052_v50  ;;  %v1000_v55 = vmax.f32 %v806_v48, 0.0 }
 0x1c2   :  { %v808_v51 = vpop.f32.mrf.mxu1  ;;  %2170 = vmatmul.mubr.bf16.gmra.mxu0 %v1053_v34 }
 0x1c3   :  { %1460 = vst.msk [vmem:[%s3402_s7 + $0xb8] sm:$0xff] %vm1436_vm1, %v817_v45  ;;  %v809_v52 = vadd.f32 %v2685_v40, %v808_v51  ;;  %v1003_v53 = vmax.f32 %v817_v45, 0.0 }
 0x1c4   :  { %v2099_v54 = vpop.f32.mrf.mxu1 }
 0x1c5   :  { %v1001_v59 = vmax.f32 %v809_v52, 0.0  ;;  %1458 = vst.msk [vmem:[%s3402_s7 + $0xa8] sm:$0xff] %vm1436_vm1, %v809_v52  ;;  %v830_v60 = vadd.f32 %v2099_v54, %v2685_v40  ;;  %v1055_v63 = vpack.c.bf16 %v1003_v53, %v1002_v61 }
 0x1c6   :  { %v821_v62 = vpop.f32.mrf.mxu1 }
 0x1c7   :  { %1463 = vst.msk [vmem:[%s3402_s7 + $0xd0] sm:$0xff] %vm1436_vm1, %v830_v60  ;;  %v822_v0 = vadd.f32 %v2685_v40, %v821_v62  ;;  %v1054_v44 = vpack.c.bf16 %v1001_v59, %v1000_v55  ;;  %v1006_v10 = vmax.f32 %v830_v60, 0.0 }
 0x1c8   :  { %v2100_v1 = vpop.f32.mrf.mxu1 }
 0x1c9   :  { %1461 = vst.msk [vmem:[%s3402_s7 + $0xc0] sm:$0xff] %vm1436_vm1, %v822_v0  ;;  %v833_v57 = vadd.f32 %v2100_v1, %v2685_v40  ;;  %2173 = vmatprep.mubr.bf16.mxu0 %v1054_v44  ;;  %v1004_v6 = vmax.f32 %v822_v0, 0.0 }
 0x1ca   :  { %v824_v13 = vpop.f32.mrf.mxu1  ;;  %2174 = vmatmul.mubr.bf16.gmra.mxu0 %v1055_v63 }
 0x1cb   :  { %1464 = vst.msk [vmem:[%s3402_s7 + $0xd8] sm:$0xff] %vm1436_vm1, %v833_v57  ;;  %v825_v2 = vadd.f32 %v2685_v40, %v824_v13  ;;  %v1007_v5 = vmax.f32 %v833_v57, 0.0 }
 0x1cc   :  { %v2103_v9 = vpop.f32.mrf.mxu1 }
 0x1cd   :  { %v1005_v7 = vmax.f32 %v825_v2, 0.0  ;;  %1462 = vst.msk [vmem:[%s3402_s7 + $0xc8] sm:$0xff] %vm1436_vm1, %v825_v2  ;;  %v846_v8 = vadd.f32 %v2103_v9, %v2685_v40  ;;  %v1057_v16 = vpack.c.bf16 %v1007_v5, %v1006_v10 }
 0x1ce   :  { %v837_v11 = vpop.f32.mrf.mxu1 }
 0x1cf   :  { %1467 = vst.msk [vmem:[%s3402_s7 + $0xf0] sm:$0xff] %vm1436_vm1, %v846_v8  ;;  %v838_v12 = vadd.f32 %v2685_v40, %v837_v11  ;;  %v1056_v15 = vpack.c.bf16 %v1005_v7, %v1004_v6  ;;  %v1010_v29 = vmax.f32 %v846_v8, 0.0 }
 0x1d0   :  { %v2104_v33 = vpop.f32.mrf.mxu1 }
 0x1d1   :  { %1465 = vst.msk [vmem:[%s3402_s7 + $0xe0] sm:$0xff] %vm1436_vm1, %v838_v12  ;;  %v849_v56 = vadd.f32 %v2104_v33, %v2685_v40  ;;  %2177 = vmatprep.mubr.bf16.mxu0 %v1056_v15  ;;  %v1008_v25 = vmax.f32 %v838_v12, 0.0 }
 0x1d2   :  { %v840_v17 = vpop.f32.mrf.mxu1  ;;  %2178 = vmatmul.mubr.bf16.gmra.mxu0 %v1057_v16 }
 0x1d3   :  { %1468 = vst.msk [vmem:[%s3402_s7 + $0xf8] sm:$0xff] %vm1436_vm1, %v849_v56  ;;  %v841_v20 = vadd.f32 %v2685_v40, %v840_v17  ;;  %v1011_v21 = vmax.f32 %v849_v56, 0.0 }
 0x1d4   :  { %v2107_v22 = vpop.f32.mrf.mxu1 }
 0x1d5   :  { %v1009_v19 = vmax.f32 %v841_v20, 0.0  ;;  %1466 = vst.msk [vmem:[%s3402_s7 + $0xe8] sm:$0xff] %vm1436_vm1, %v841_v20  ;;  %v862_v26 = vadd.f32 %v2107_v22, %v2685_v40  ;;  %v1059_v28 = vpack.c.bf16 %v1011_v21, %v1010_v29 }
 0x1d6   :  { %v853_v58 = vpop.f32.mrf.mxu1 }
 0x1d7   :  { %1471 = vst.msk [vmem:[%s3402_s7 + $0x110] sm:$0xff] %vm1436_vm1, %v862_v26  ;;  %v854_v27 = vadd.f32 %v2685_v40, %v853_v58  ;;  %v1058_v18 = vpack.c.bf16 %v1009_v19, %v1008_v25  ;;  %v1014_v49 = vmax.f32 %v862_v26, 0.0 }
 0x1d8   :  { %v2108_v4 = vpop.f32.mrf.mxu1 }
 0x1d9   :  { %1469 = vst.msk [vmem:[%s3402_s7 + $0x100] sm:$0xff] %vm1436_vm1, %v854_v27  ;;  %v865_v30 = vadd.f32 %v2108_v4, %v2685_v40  ;;  %2181 = vmatprep.mubr.bf16.mxu0 %v1058_v18  ;;  %v1012_v37 = vmax.f32 %v854_v27, 0.0 }
 0x1da   :  { %v856_v31 = vpop.f32.mrf.mxu1  ;;  %2182 = vmatmul.mubr.bf16.gmra.mxu0 %v1059_v28 }
 0x1db   :  { %1472 = vst.msk [vmem:[%s3402_s7 + $0x118] sm:$0xff] %vm1436_vm1, %v865_v30  ;;  %v857_v32 = vadd.f32 %v2685_v40, %v856_v31  ;;  %v1015_v35 = vmax.f32 %v865_v30, 0.0 }
 0x1dc   :  { %v2111_v36 = vpop.f32.mrf.mxu1 }
 0x1dd   :  { %v1013_v38 = vmax.f32 %v857_v32, 0.0  ;;  %1470 = vst.msk [vmem:[%s3402_s7 + $0x108] sm:$0xff] %vm1436_vm1, %v857_v32  ;;  %v878_v39 = vadd.f32 %v2111_v36, %v2685_v40  ;;  %v1061_v42 = vpack.c.bf16 %v1015_v35, %v1014_v49 }
 0x1de   :  { %v869_v14 = vpop.f32.mrf.mxu1 }
 0x1df   :  { %1475 = vst.msk [vmem:[%s3402_s7 + $0x130] sm:$0xff] %vm1436_vm1, %v878_v39  ;;  %v870_v24 = vadd.f32 %v2685_v40, %v869_v14  ;;  %v1060_v41 = vpack.c.bf16 %v1013_v38, %v1012_v37  ;;  %v1018_v51 = vmax.f32 %v878_v39, 0.0 }
 0x1e0   :  { %v2112_v43 = vpop.f32.mrf.mxu1 }
 0x1e1   :  { %1473 = vst.msk [vmem:[%s3402_s7 + $0x120] sm:$0xff] %vm1436_vm1, %v870_v24  ;;  %v881_v46 = vadd.f32 %v2112_v43, %v2685_v40  ;;  %2185 = vmatprep.mubr.bf16.mxu0 %v1060_v41  ;;  %v1016_v23 = vmax.f32 %v870_v24, 0.0 }
 0x1e2   :  { %v872_v47 = vpop.f32.mrf.mxu1  ;;  %2186 = vmatmul.mubr.bf16.gmra.mxu0 %v1061_v42 }
 0x1e3   :  { %1476 = vst.msk [vmem:[%s3402_s7 + $0x138] sm:$0xff] %vm1436_vm1, %v881_v46  ;;  %v873_v3 = vadd.f32 %v2685_v40, %v872_v47  ;;  %v1019_v48 = vmax.f32 %v881_v46, 0.0 }
 0x1e4   :  { %v2115_v50 = vpop.f32.mrf.mxu1 }
 0x1e5   :  { %v1017_v34 = vmax.f32 %v873_v3, 0.0  ;;  %1474 = vst.msk [vmem:[%s3402_s7 + $0x128] sm:$0xff] %vm1436_vm1, %v873_v3  ;;  %v894_v45 = vadd.f32 %v2115_v50, %v2685_v40  ;;  %v1063_v59 = vpack.c.bf16 %v1019_v48, %v1018_v51 }
 0x1e6   :  { %v885_v52 = vpop.f32.mrf.mxu1 }
 0x1e7   :  { %1479 = vst.msk [vmem:[%s3402_s7 + $0x150] sm:$0xff] %vm1436_vm1, %v894_v45  ;;  %v886_v53 = vadd.f32 %v2685_v40, %v885_v52  ;;  %v1062_v54 = vpack.c.bf16 %v1017_v34, %v1016_v23  ;;  %v1022_v13 = vmax.f32 %v894_v45, 0.0 }
 0x1e8   :  { %v2116_v55 = vpop.f32.mrf.mxu1 }
 0x1e9   :  { %1477 = vst.msk [vmem:[%s3402_s7 + $0x140] sm:$0xff] %vm1436_vm1, %v886_v53  ;;  %v897_v60 = vadd.f32 %v2116_v55, %v2685_v40  ;;  %2189 = vmatprep.mubr.bf16.mxu0 %v1062_v54  ;;  %v1020_v1 = vmax.f32 %v886_v53, 0.0 }
 0x1ea   :  { %v888_v61 = vpop.f32.mrf.mxu1  ;;  %2190 = vmatmul.mubr.bf16.gmra.mxu0 %v1063_v59 }
 0x1eb   :  { %1480 = vst.msk [vmem:[%s3402_s7 + $0x158] sm:$0xff] %vm1436_vm1, %v897_v60  ;;  %v889_v62 = vadd.f32 %v2685_v40, %v888_v61  ;;  %v1023_v0 = vmax.f32 %v897_v60, 0.0 }
 0x1ec   :  { %v2119_v44 = vpop.f32.mrf.mxu1 }
 0x1ed   :  { %v1021_v63 = vmax.f32 %v889_v62, 0.0  ;;  %1478 = vst.msk [vmem:[%s3402_s7 + $0x148] sm:$0xff] %vm1436_vm1, %v889_v62  ;;  %v910_v57 = vadd.f32 %v2119_v44, %v2685_v40  ;;  %v1065_v7 = vpack.c.bf16 %v1023_v0, %v1022_v13 }
 0x1ee   :  { %v901_v2 = vpop.f32.mrf.mxu1 }
 0x1ef   :  { %1483 = vst.msk [vmem:[%s3402_s7 + $0x170] sm:$0xff] %vm1436_vm1, %v910_v57  ;;  %v902_v5 = vadd.f32 %v2685_v40, %v901_v2  ;;  %v1064_v9 = vpack.c.bf16 %v1021_v63, %v1020_v1  ;;  %v1026_v17 = vmax.f32 %v910_v57, 0.0 }
 0x1f0   :  { %v2120_v6 = vpop.f32.mrf.mxu1 }
 0x1f1   :  { %1481 = vst.msk [vmem:[%s3402_s7 + $0x160] sm:$0xff] %vm1436_vm1, %v902_v5  ;;  %v913_v8 = vadd.f32 %v2120_v6, %v2685_v40  ;;  %2193 = vmatprep.mubr.bf16.mxu0 %v1064_v9  ;;  %v1024_v33 = vmax.f32 %v902_v5, 0.0 }
 0x1f2   :  { %v904_v10 = vpop.f32.mrf.mxu1  ;;  %2194 = vmatmul.mubr.bf16.gmra.mxu0 %v1065_v7 }
 0x1f3   :  { %1484 = vst.msk [vmem:[%s3402_s7 + $0x178] sm:$0xff] %vm1436_vm1, %v913_v8  ;;  %v905_v11 = vadd.f32 %v2685_v40, %v904_v10  ;;  %v1027_v12 = vmax.f32 %v913_v8, 0.0 }
 0x1f4   :  { %v2123_v15 = vpop.f32.mrf.mxu1 }
 0x1f5   :  { %v1025_v16 = vmax.f32 %v905_v11, 0.0  ;;  %1482 = vst.msk [vmem:[%s3402_s7 + $0x168] sm:$0xff] %vm1436_vm1, %v905_v11  ;;  %v926_v56 = vadd.f32 %v2123_v15, %v2685_v40  ;;  %v1067_v19 = vpack.c.bf16 %v1027_v12, %v1026_v17  ;;  %v3010_v11 = vld [vmem:[%s3403_s6] ss:$0 sm:$0xff] }
 0x1f6   :  { %v917_v20 = vpop.f32.mrf.mxu1 }
 0x1f7   :  { %1487 = vst.msk [vmem:[%s3402_s7 + $0x190] sm:$0xff] %vm1436_vm1, %v926_v56  ;;  %v918_v21 = vadd.f32 %v2685_v40, %v917_v20  ;;  %v1066_v22 = vpack.c.bf16 %v1025_v16, %v1024_v33  ;;  %v1030_v31 = vmax.f32 %v926_v56, 0.0 }
 0x1f8   :  { %v2124_v25 = vpop.f32.mrf.mxu1 }
 0x1f9   :  { %1485 = vst.msk [vmem:[%s3402_s7 + $0x180] sm:$0xff] %vm1436_vm1, %v918_v21  ;;  %v929_v26 = vadd.f32 %v2124_v25, %v2685_v40  ;;  %2197 = vmatprep.mubr.bf16.mxu0 %v1066_v22  ;;  %v1028_v4 = vmax.f32 %v918_v21, 0.0 }
 0x1fa   :  { %v920_v29 = vpop.f32.mrf.mxu1  ;;  %2198 = vmatmul.mubr.bf16.gmra.mxu0 %v1067_v19 }
 0x1fb   :  { %1488 = vst.msk [vmem:[%s3402_s7 + $0x198] sm:$0xff] %vm1436_vm1, %v929_v26  ;;  %v921_v58 = vadd.f32 %v2685_v40, %v920_v29  ;;  %v1031_v27 = vmax.f32 %v929_v26, 0.0 }
 0x1fc   :  { %v2127_v18 = vpop.f32.mrf.mxu1 }
 0x1fd   :  { %v1029_v28 = vmax.f32 %v921_v58, 0.0  ;;  %1486 = vst.msk [vmem:[%s3402_s7 + $0x188] sm:$0xff] %vm1436_vm1, %v921_v58  ;;  %v942_v30 = vadd.f32 %v2127_v18, %v2685_v40  ;;  %v1069_v38 = vpack.c.bf16 %v1031_v27, %v1030_v31 }
 0x1fe   :  { %v933_v32 = vpop.f32.mrf.mxu1 }
 0x1ff   :  { %1491 = vst.msk [vmem:[%s3402_s7 + $0x1b0] sm:$0xff] %vm1436_vm1, %v942_v30  ;;  %v934_v35 = vadd.f32 %v2685_v40, %v933_v32  ;;  %v1068_v36 = vpack.c.bf16 %v1029_v28, %v1028_v4  ;;  %v1034_v47 = vmax.f32 %v942_v30, 0.0 }
 0x200   :  { %v2128_v37 = vpop.f32.mrf.mxu1 }
 0x201   :  { %1489 = vst.msk [vmem:[%s3402_s7 + $0x1a0] sm:$0xff] %vm1436_vm1, %v934_v35  ;;  %v945_v39 = vadd.f32 %v2128_v37, %v2685_v40  ;;  %2201 = vmatprep.mubr.bf16.mxu0 %v1068_v36  ;;  %v1032_v43 = vmax.f32 %v934_v35, 0.0 }
 0x202   :  { %v936_v49 = vpop.f32.mrf.mxu1  ;;  %2202 = vmatmul.mubr.bf16.gmra.mxu0 %v1069_v38 }
 0x203   :  { %1492 = vst.msk [vmem:[%s3402_s7 + $0x1b8] sm:$0xff] %vm1436_vm1, %v945_v39  ;;  %v937_v14 = vadd.f32 %v2685_v40, %v936_v49  ;;  %v1035_v24 = vmax.f32 %v945_v39, 0.0 }
 0x204   :  { %v2131_v41 = vpop.f32.mrf.mxu1 }
 0x205   :  { %v1033_v42 = vmax.f32 %v937_v14, 0.0  ;;  %1490 = vst.msk [vmem:[%s3402_s7 + $0x1a8] sm:$0xff] %vm1436_vm1, %v937_v14  ;;  %v958_v46 = vadd.f32 %v2131_v41, %v2685_v40  ;;  %v1071_v34 = vpack.c.bf16 %v1035_v24, %v1034_v47 }
 0x206   :  { %v949_v3 = vpop.f32.mrf.mxu1 }
 0x207   :  { %1495 = vst.msk [vmem:[%s3402_s7 + $0x1d0] sm:$0xff] %vm1436_vm1, %v958_v46  ;;  %v950_v48 = vadd.f32 %v2685_v40, %v949_v3  ;;  %v1070_v50 = vpack.c.bf16 %v1033_v42, %v1032_v43  ;;  %v1038_v61 = vmax.f32 %v958_v46, 0.0 }
 0x208   :  { %v2132_v23 = vpop.f32.mrf.mxu1 }
 0x209   :  { %1493 = vst.msk [vmem:[%s3402_s7 + $0x1c0] sm:$0xff] %vm1436_vm1, %v950_v48  ;;  %v961_v45 = vadd.f32 %v2132_v23, %v2685_v40  ;;  %2205 = vmatprep.mubr.bf16.mxu0 %v1070_v50  ;;  %v1036_v55 = vmax.f32 %v950_v48, 0.0 }
 0x20a   :  { %v952_v51 = vpop.f32.mrf.mxu1  ;;  %2206 = vmatmul.mubr.bf16.gmra.mxu0 %v1071_v34 }
 0x20b   :  { %1496 = vst.msk [vmem:[%s3402_s7 + $0x1d8] sm:$0xff] %vm1436_vm1, %v961_v45  ;;  %v953_v52 = vadd.f32 %v2685_v40, %v952_v51  ;;  %v1039_v53 = vmax.f32 %v961_v45, 0.0 }
 0x20c   :  { %v2135_v54 = vpop.f32.mrf.mxu1 }
 0x20d   :  { %v1037_v59 = vmax.f32 %v953_v52, 0.0  ;;  %1494 = vst.msk [vmem:[%s3402_s7 + $0x1c8] sm:$0xff] %vm1436_vm1, %v953_v52  ;;  %v974_v60 = vadd.f32 %v2135_v54, %v2685_v40  ;;  %v1073_v63 = vpack.c.bf16 %v1039_v53, %v1038_v61 }
 0x20e   :  { %v965_v62 = vpop.f32.mrf.mxu1 }
 0x20f   :  { %1499 = vst.msk [vmem:[%s3402_s7 + $0x1f0] sm:$0xff] %vm1436_vm1, %v974_v60  ;;  %v966_v0 = vadd.f32 %v2685_v40, %v965_v62  ;;  %v1072_v44 = vpack.c.bf16 %v1037_v59, %v1036_v55  ;;  %v1042_v7 = vmax.f32 %v974_v60, 0.0 }
 0x210   :  { %v2136_v1 = vpop.f32.mrf.mxu1 }
 0x211   :  { %1497 = vst.msk [vmem:[%s3402_s7 + $0x1e0] sm:$0xff] %vm1436_vm1, %v966_v0  ;;  %v977_v57 = vadd.f32 %v2136_v1, %v2685_v40  ;;  %2209 = vmatprep.mubr.bf16.mxu0 %v1072_v44  ;;  %v1040_v9 = vmax.f32 %v966_v0, 0.0 }
 0x212   :  { %v968_v13 = vpop.f32.mrf.mxu1  ;;  %2210 = vmatmul.mubr.bf16.gmra.mxu0 %v1073_v63 }
 0x213   :  { %1500 = vst.msk [vmem:[%s3402_s7 + $0x1f8] sm:$0xff] %vm1436_vm1, %v977_v57  ;;  %v969_v2 = vadd.f32 %v2685_v40, %v968_v13  ;;  %v1043_v5 = vmax.f32 %v977_v57, 0.0 }
 0x215   :  { %v1041_v6 = vmax.f32 %v969_v2, 0.0  ;;  %1498 = vst.msk [vmem:[%s3402_s7 + $0x1e8] sm:$0xff] %vm1436_vm1, %v969_v2  ;;  %v1075_v10 = vpack.c.bf16 %v1043_v5, %v1042_v7 }
 0x217   :  { %v1074_v8 = vpack.c.bf16 %v1041_v6, %v1040_v9 }
 0x219   :  { %2213 = vmatprep.mubr.bf16.mxu0 %v1074_v8 }
 0x21a   :  { %2214 = vmatmul.mubr.bf16.gmra.mxu0 %v1075_v10 }
 0x262   :  { %v2155_v12 = vpop.f32.mrf.mxu0 }
 0x263   :  { %v1190_v40 = vadd.f32 %v2155_v12, %v3010_v11 }
 0x264   :  { %v1181_v15 = vpop.f32.mrf.mxu0 }
 0x265   :  { %v1182_v33 = vadd.f32 %v3010_v11, %v1181_v15  ;;  %1569 = vrot.lane.b32.xlu1 %v1190_v40, %s2237_s29 }
 0x266   :  { %v2156_v16 = vpop.f32.mrf.mxu0 }
 0x267   :  { %v1193_v56 = vadd.f32 %v2156_v16, %v3010_v11  ;;  %1565 = vrot.lane.b32.xlu0 %v1182_v33, %s2237_s29 }
 0x268   :  { %v1184_v17 = vpop.f32.mrf.mxu0 }
 0x269   :  { %v1185_v20 = vadd.f32 %v3010_v11, %v1184_v17  ;;  %1571 = vrot.lane.b32.xlu1 %v1193_v56, %s2237_s29 }
 0x26a   :  { %v2159_v21 = vpop.f32.mrf.mxu0 }
 0x26b   :  { %1567 = vrot.lane.b32.xlu0 %v1185_v20, %s2237_s29  ;;  %v1206_v25 = vadd.f32 %v2159_v21, %v3010_v11 }
 0x26c   :  { %v1197_v22 = vpop.f32.mrf.mxu0 }
 0x26d   :  { %v1198_v58 = vadd.f32 %v3010_v11, %v1197_v22 }
 0x26e   :  { %v2160_v19 = vpop.f32.mrf.mxu0 }
 0x26f   :  { %v1209_v26 = vadd.f32 %v2160_v19, %v3010_v11  ;;  %1577 = vrot.lane.b32.xlu0 %v1206_v25, %s2237_s29 }
 0x270   :  { %v1200_v29 = vpop.f32.mrf.mxu0 }
 0x271   :  { %1579 = vrot.lane.b32.xlu1 %v1209_v26, %s2237_s29  ;;  %v1201_v18 = vadd.f32 %v3010_v11, %v1200_v29 }
 0x272   :  { %v2163_v27 = vpop.f32.mrf.mxu0 }
 0x273   :  { %1573 = vrot.lane.b32.xlu0 %v1198_v58, %s2237_s29  ;;  %v1222_v28 = vadd.f32 %v2163_v27, %v3010_v11 }
 0x274   :  { %v1213_v4 = vpop.f32.mrf.mxu0 }
 0x275   :  { %1575 = vrot.lane.b32.xlu1 %v1201_v18, %s2237_s29  ;;  %v1214_v35 = vadd.f32 %v3010_v11, %v1213_v4 }
 0x276   :  { %v2164_v30 = vpop.f32.mrf.mxu0 }
 0x277   :  { %v1225_v31 = vadd.f32 %v2164_v30, %v3010_v11  ;;  %1585 = vrot.lane.b32.xlu0 %v1222_v28, %s2237_s29 }
 0x278   :  { %v1216_v32 = vpop.f32.mrf.mxu0 }
 0x279   :  { %1587 = vrot.lane.b32.xlu1 %v1225_v31, %s2237_s29  ;;  %v1217_v37 = vadd.f32 %v3010_v11, %v1216_v32 }
 0x27a   :  { %v2167_v36 = vpop.f32.mrf.mxu0 }
 0x27b   :  { %1581 = vrot.lane.b32.xlu0 %v1214_v35, %s2237_s29  ;;  %v1238_v39 = vadd.f32 %v2167_v36, %v3010_v11 }
 0x27c   :  { %v1229_v38 = vpop.f32.mrf.mxu0 }
 0x27d   :  { %1583 = vrot.lane.b32.xlu1 %v1217_v37, %s2237_s29  ;;  %v1230_v41 = vadd.f32 %v3010_v11, %v1229_v38 }
 0x27e   :  { %v2168_v49 = vpop.f32.mrf.mxu0 }
 0x27f   :  { %v1241_v14 = vadd.f32 %v2168_v49, %v3010_v11  ;;  %1593 = vrot.lane.b32.xlu0 %v1238_v39, %s2237_s29 }
 0x280   :  { %v1232_v24 = vpop.f32.mrf.mxu0 }
 0x281   :  { %1595 = vrot.lane.b32.xlu1 %v1241_v14, %s2237_s29  ;;  %v1233_v42 = vadd.f32 %v3010_v11, %v1232_v24 }
 0x282   :  { %v2171_v43 = vpop.f32.mrf.mxu0 }
 0x283   :  { %1589 = vrot.lane.b32.xlu0 %v1230_v41, %s2237_s29  ;;  %v1254_v47 = vadd.f32 %v2171_v43, %v3010_v11 }
 0x284   :  { %v1245_v46 = vpop.f32.mrf.mxu0 }
 0x285   :  { %1591 = vrot.lane.b32.xlu1 %v1233_v42, %s2237_s29  ;;  %v1246_v23 = vadd.f32 %v3010_v11, %v1245_v46 }
 0x286   :  { %v2172_v3 = vpop.f32.mrf.mxu0 }
 0x287   :  { %v1257_v48 = vadd.f32 %v2172_v3, %v3010_v11  ;;  %1601 = vrot.lane.b32.xlu0 %v1254_v47, %s2237_s29 }
 0x288   :  { %v1248_v50 = vpop.f32.mrf.mxu0 }
 0x289   :  { %1603 = vrot.lane.b32.xlu1 %v1257_v48, %s2237_s29  ;;  %v1249_v45 = vadd.f32 %v3010_v11, %v1248_v50 }
 0x28a   :  { %v2175_v34 = vpop.f32.mrf.mxu0 }
 0x28b   :  { %1597 = vrot.lane.b32.xlu0 %v1246_v23, %s2237_s29  ;;  %v1270_v52 = vadd.f32 %v2175_v34, %v3010_v11 }
 0x28c   :  { %v1261_v51 = vpop.f32.mrf.mxu0 }
 0x28d   :  { %1599 = vrot.lane.b32.xlu1 %v1249_v45, %s2237_s29  ;;  %v1262_v59 = vadd.f32 %v3010_v11, %v1261_v51 }
 0x28e   :  { %v2176_v53 = vpop.f32.mrf.mxu0 }
 0x28f   :  { %v1273_v54 = vadd.f32 %v2176_v53, %v3010_v11  ;;  %1609 = vrot.lane.b32.xlu0 %v1270_v52, %s2237_s29 }
 0x290   :  { %v1264_v55 = vpop.f32.mrf.mxu0 }
 0x291   :  { %1611 = vrot.lane.b32.xlu1 %v1273_v54, %s2237_s29  ;;  %v1265_v61 = vadd.f32 %v3010_v11, %v1264_v55 }
 0x292   :  { %v2179_v60 = vpop.f32.mrf.mxu0 }
 0x293   :  { %1605 = vrot.lane.b32.xlu0 %v1262_v59, %s2237_s29  ;;  %v1286_v0 = vadd.f32 %v2179_v60, %v3010_v11 }
 0x294   :  { %v1277_v62 = vpop.f32.mrf.mxu0 }
 0x295   :  { %1607 = vrot.lane.b32.xlu1 %v1265_v61, %s2237_s29  ;;  %v1278_v57 = vadd.f32 %v3010_v11, %v1277_v62 }
 0x296   :  { %v2180_v44 = vpop.f32.mrf.mxu0 }
 0x297   :  { %v1289_v1 = vadd.f32 %v2180_v44, %v3010_v11  ;;  %1617 = vrot.lane.b32.xlu0 %v1286_v0, %s2237_s29 }
 0x298   :  { %v1280_v63 = vpop.f32.mrf.mxu0 }
 0x299   :  { %1619 = vrot.lane.b32.xlu1 %v1289_v1, %s2237_s29  ;;  %v1281_v2 = vadd.f32 %v3010_v11, %v1280_v63 }
 0x29a   :  { %v2183_v13 = vpop.f32.mrf.mxu0 }
 0x29b   :  { %1613 = vrot.lane.b32.xlu0 %v1278_v57, %s2237_s29  ;;  %v1302_v9 = vadd.f32 %v2183_v13, %v3010_v11 }
 0x29c   :  { %v1293_v5 = vpop.f32.mrf.mxu0 }
 0x29d   :  { %1615 = vrot.lane.b32.xlu1 %v1281_v2, %s2237_s29  ;;  %v1294_v10 = vadd.f32 %v3010_v11, %v1293_v5 }
 0x29e   :  { %v2184_v6 = vpop.f32.mrf.mxu0 }
 0x29f   :  { %v1305_v7 = vadd.f32 %v2184_v6, %v3010_v11  ;;  %1625 = vrot.lane.b32.xlu0 %v1302_v9, %s2237_s29 }
 0x2a0   :  { %v1296_v8 = vpop.f32.mrf.mxu0 }
 0x2a1   :  { %1627 = vrot.lane.b32.xlu1 %v1305_v7, %s2237_s29  ;;  %v1297_v40 = vadd.f32 %v3010_v11, %v1296_v8 }
 0x2a2   :  { %v2187_v12 = vpop.f32.mrf.mxu0 }
 0x2a3   :  { %1621 = vrot.lane.b32.xlu0 %v1294_v10, %s2237_s29  ;;  %v1318_v33 = vadd.f32 %v2187_v12, %v3010_v11 }
 0x2a4   :  { %v1309_v15 = vpop.f32.mrf.mxu0 }
 0x2a5   :  { %1623 = vrot.lane.b32.xlu1 %v1297_v40, %s2237_s29  ;;  %v1310_v20 = vadd.f32 %v3010_v11, %v1309_v15 }
 0x2a6   :  { %v2188_v16 = vpop.f32.mrf.mxu0 }
 0x2a7   :  { %v1321_v56 = vadd.f32 %v2188_v16, %v3010_v11  ;;  %1633 = vrot.lane.b32.xlu0 %v1318_v33, %s2237_s29 }
 0x2a8   :  { %v1312_v17 = vpop.f32.mrf.mxu0 }
 0x2a9   :  { %1635 = vrot.lane.b32.xlu1 %v1321_v56, %s2237_s29  ;;  %v1313_v22 = vadd.f32 %v3010_v11, %v1312_v17 }
 0x2aa   :  { %v2191_v21 = vpop.f32.mrf.mxu0 }
 0x2ab   :  { %1629 = vrot.lane.b32.xlu0 %v1310_v20, %s2237_s29  ;;  %v1334_v19 = vadd.f32 %v2191_v21, %v3010_v11 }
 0x2ac   :  { %v1325_v25 = vpop.f32.mrf.mxu0 }
 0x2ad   :  { %1631 = vrot.lane.b32.xlu1 %v1313_v22, %s2237_s29  ;;  %v1326_v27 = vadd.f32 %v3010_v11, %v1325_v25 }
 0x2ae   :  { %v2192_v26 = vpop.f32.mrf.mxu0 }
 0x2af   :  { %v1337_v29 = vadd.f32 %v2192_v26, %v3010_v11  ;;  %1641 = vrot.lane.b32.xlu0 %v1334_v19, %s2237_s29 }
 0x2b0   :  { %v1328_v58 = vpop.f32.mrf.mxu0 }
 0x2b1   :  { %1643 = vrot.lane.b32.xlu1 %v1337_v29, %s2237_s29  ;;  %v1329_v4 = vadd.f32 %v3010_v11, %v1328_v58 }
 0x2b2   :  { %v2195_v18 = vpop.f32.mrf.mxu0 }
 0x2b3   :  { %1637 = vrot.lane.b32.xlu0 %v1326_v27, %s2237_s29  ;;  %v1350_v30 = vadd.f32 %v2195_v18, %v3010_v11 }
 0x2b4   :  { %v1341_v28 = vpop.f32.mrf.mxu0 }
 0x2b5   :  { %1639 = vrot.lane.b32.xlu1 %v1329_v4, %s2237_s29  ;;  %v1342_v36 = vadd.f32 %v3010_v11, %v1341_v28 }
 0x2b6   :  { %v2196_v31 = vpop.f32.mrf.mxu0 }
 0x2b7   :  { %v1353_v32 = vadd.f32 %v2196_v31, %v3010_v11  ;;  %1649 = vrot.lane.b32.xlu0 %v1350_v30, %s2237_s29 }
 0x2b8   :  { %v1344_v35 = vpop.f32.mrf.mxu0 }
 0x2b9   :  { %1651 = vrot.lane.b32.xlu1 %v1353_v32, %s2237_s29  ;;  %v1345_v38 = vadd.f32 %v3010_v11, %v1344_v35 }
 0x2ba   :  { %v2199_v37 = vpop.f32.mrf.mxu0 }
 0x2bb   :  { %1645 = vrot.lane.b32.xlu0 %v1342_v36, %s2237_s29  ;;  %v1366_v49 = vadd.f32 %v2199_v37, %v3010_v11 }
 0x2bc   :  { %v1357_v39 = vpop.f32.mrf.mxu0 }
 0x2bd   :  { %1647 = vrot.lane.b32.xlu1 %v1345_v38, %s2237_s29  ;;  %v1358_v43 = vadd.f32 %v3010_v11, %v1357_v39 }
 0x2be   :  { %v2200_v14 = vpop.f32.mrf.mxu0 }
 0x2bf   :  { %v1369_v24 = vadd.f32 %v2200_v14, %v3010_v11  ;;  %1657 = vrot.lane.b32.xlu0 %v1366_v49, %s2237_s29 }
 0x2c0   :  { %v1360_v41 = vpop.f32.mrf.mxu0 }
 0x2c1   :  { %1659 = vrot.lane.b32.xlu1 %v1369_v24, %s2237_s29  ;;  %v1361_v46 = vadd.f32 %v3010_v11, %v1360_v41 }
 0x2c2   :  { %v2203_v42 = vpop.f32.mrf.mxu0 }
 0x2c3   :  { %1653 = vrot.lane.b32.xlu0 %v1358_v43, %s2237_s29  ;;  %v1382_v3 = vadd.f32 %v2203_v42, %v3010_v11 }
 0x2c4   :  { %v1373_v47 = vpop.f32.mrf.mxu0 }
 0x2c5   :  { %1655 = vrot.lane.b32.xlu1 %v1361_v46, %s2237_s29  ;;  %v1374_v34 = vadd.f32 %v3010_v11, %v1373_v47 }
 0x2c6   :  { %v2204_v48 = vpop.f32.mrf.mxu0 }
 0x2c7   :  { %v1385_v50 = vadd.f32 %v2204_v48, %v3010_v11  ;;  %1665 = vrot.lane.b32.xlu0 %v1382_v3, %s2237_s29 }
 0x2c8   :  { %v1376_v23 = vpop.f32.mrf.mxu0 }
 0x2c9   :  { %1667 = vrot.lane.b32.xlu1 %v1385_v50, %s2237_s29  ;;  %v1377_v51 = vadd.f32 %v3010_v11, %v1376_v23 }
 0x2ca   :  { %v2207_v45 = vpop.f32.mrf.mxu0 }
 0x2cb   :  { %1661 = vrot.lane.b32.xlu0 %v1374_v34, %s2237_s29  ;;  %v1398_v53 = vadd.f32 %v2207_v45, %v3010_v11 }
 0x2cc   :  { %v1389_v52 = vpop.f32.mrf.mxu0 }
 0x2cd   :  { %1663 = vrot.lane.b32.xlu1 %v1377_v51, %s2237_s29  ;;  %v1390_v60 = vadd.f32 %v3010_v11, %v1389_v52 }
 0x2ce   :  { %v2208_v54 = vpop.f32.mrf.mxu0 }
 0x2cf   :  { %v1401_v55 = vadd.f32 %v2208_v54, %v3010_v11  ;;  %1673 = vrot.lane.b32.xlu0 %v1398_v53, %s2237_s29 }
 0x2d0   :  { %v1392_v59 = vpop.f32.mrf.mxu0 }
 0x2d1   :  { %1675 = vrot.lane.b32.xlu1 %v1401_v55, %s2237_s29  ;;  %v1393_v62 = vadd.f32 %v3010_v11, %v1392_v59 }
 0x2d2   :  { %v2211_v61 = vpop.f32.mrf.mxu0 }
 0x2d3   :  { %1669 = vrot.lane.b32.xlu0 %v1390_v60, %s2237_s29  ;;  %v1414_v44 = vadd.f32 %v2211_v61, %v3010_v11 }
 0x2d4   :  { %v1405_v0 = vpop.f32.mrf.mxu0 }
 0x2d5   :  { %1671 = vrot.lane.b32.xlu1 %v1393_v62, %s2237_s29  ;;  %v1406_v2 = vadd.f32 %v3010_v11, %v1405_v0 }
 0x2d6   :  { %v2212_v1 = vpop.f32.mrf.mxu0 }
 0x2d7   :  { %v1417_v63 = vadd.f32 %v2212_v1, %v3010_v11  ;;  %v1570_v57 = vpop.permute.xlu1 %1569  ;;  %1681 = vrot.lane.b32.xlu0 %v1414_v44, %s2237_s29 }
 0x2d8   :  { %1760 = vst.msk [vmem:[%s3402_s7 + $0x10] sm:$0xff] %vm1757_vm2, %v1570_v57  ;;  %v1408_v13 = vpop.f32.mrf.mxu0 }
 0x2d9   :  { %1683 = vrot.lane.b32.xlu1 %v1417_v63, %s2237_s29  ;;  %v1566_v5 = vpop.permute.xlu0 %1565  ;;  %v1409_v6 = vadd.f32 %v3010_v11, %v1408_v13 }
 0x2da   :  { %1758 = vst.msk [vmem:[%s3402_s7] sm:$0xff] %vm1757_vm2, %v1566_v5  ;;  %v2215_v9 = vpop.f32.mrf.mxu0 }
 0x2db   :  { %v1572_v7 = vpop.permute.xlu1 %1571  ;;  %1677 = vrot.lane.b32.xlu0 %v1406_v2, %s2237_s29  ;;  %v1430_v33 = vadd.f32 %v2215_v9, %v3010_v11 }
 0x2dc   :  { %1761 = vst.msk [vmem:[%s3402_s7 + $0x18] sm:$0xff] %vm1757_vm2, %v1572_v7  ;;  %v1421_v8 = vpop.f32.mrf.mxu0 }
 0x2dd   :  { %v1422_v10 = vadd.f32 %v3010_v11, %v1421_v8  ;;  %1679 = vrot.lane.b32.xlu1 %v1409_v6, %s2237_s29  ;;  %v1568_v12 = vpop.permute.xlu0 %1567 }
 0x2de   :  { %1759 = vst.msk [vmem:[%s3402_s7 + $0x8] sm:$0xff] %vm1757_vm2, %v1568_v12  ;;  %v2216_v40 = vpop.f32.mrf.mxu0 }
 0x2df   :  { %1685 = vrot.lane.b32.xlu0 %v1422_v10, %s2237_s29  ;;  %v1433_v20 = vadd.f32 %v2216_v40, %v3010_v11 }
 0x2e0   :  { %v1424_v15 = vpop.f32.mrf.mxu0 }
 0x2e1   :  { %v1425_v16 = vadd.f32 %v3010_v11, %v1424_v15  ;;  %v1578_v56 = vpop.permute.xlu0 %1577 }
 0x2e2   :  { %1764 = vst.msk [vmem:[%s3402_s7 + $0x30] sm:$0xff] %vm1757_vm2, %v1578_v56 }
 0x2e3   :  { %v1580_v17 = vpop.permute.xlu1 %1579  ;;  %1687 = vrot.lane.b32.xlu1 %v1425_v16, %s2237_s29  ;;  %1689 = vrot.lane.b32.xlu0 %v1430_v33, %s2237_s29 }
 0x2e4   :  { %1765 = vst.msk [vmem:[%s3402_s7 + $0x38] sm:$0xff] %vm1757_vm2, %v1580_v17 }
 0x2e5   :  { %v1574_v21 = vpop.permute.xlu0 %1573 }
 0x2e6   :  { %1762 = vst.msk [vmem:[%s3402_s7 + $0x20] sm:$0xff] %vm1757_vm2, %v1574_v21 }
 0x2e7   :  { %1691 = vrot.lane.b32.xlu1 %v1433_v20, %s2237_s29  ;;  %v1576_v22 = vpop.permute.xlu1 %1575 }
 0x2e8   :  { %1763 = vst.msk [vmem:[%s3402_s7 + $0x28] sm:$0xff] %vm1757_vm2, %v1576_v22 }
 0x2e9   :  { %v1586_v25 = vpop.permute.xlu0 %1585 }
 0x2ea   :  { %1768 = vst.msk [vmem:[%s3402_s7 + $0x50] sm:$0xff] %vm1757_vm2, %v1586_v25 }
 0x2eb   :  { %v1588_v11 = vpop.permute.xlu1 %1587 }
 0x2ec   :  { %1769 = vst.msk [vmem:[%s3402_s7 + $0x58] sm:$0xff] %vm1757_vm2, %v1588_v11 }
 0x2ed   :  { %v1582_v19 = vpop.permute.xlu0 %1581 }
 0x2ee   :  { %1766 = vst.msk [vmem:[%s3402_s7 + $0x40] sm:$0xff] %vm1757_vm2, %v1582_v19 }
 0x2ef   :  { %v1584_v26 = vpop.permute.xlu1 %1583 }
 0x2f0   :  { %1767 = vst.msk [vmem:[%s3402_s7 + $0x48] sm:$0xff] %vm1757_vm2, %v1584_v26 }
 0x2f1   :  { %v1594_v29 = vpop.permute.xlu0 %1593 }
 0x2f2   :  { %1772 = vst.msk [vmem:[%s3402_s7 + $0x70] sm:$0xff] %vm1757_vm2, %v1594_v29 }
 0x2f3   :  { %v1596_v58 = vpop.permute.xlu1 %1595 }
 0x2f4   :  { %1773 = vst.msk [vmem:[%s3402_s7 + $0x78] sm:$0xff] %vm1757_vm2, %v1596_v58 }
 0x2f5   :  { %v1590_v27 = vpop.permute.xlu0 %1589 }
 0x2f6   :  { %1770 = vst.msk [vmem:[%s3402_s7 + $0x60] sm:$0xff] %vm1757_vm2, %v1590_v27 }
 0x2f7   :  { %v1592_v18 = vpop.permute.xlu1 %1591 }
 0x2f8   :  { %1771 = vst.msk [vmem:[%s3402_s7 + $0x68] sm:$0xff] %vm1757_vm2, %v1592_v18 }
 0x2f9   :  { %v1602_v4 = vpop.permute.xlu0 %1601 }
 0x2fa   :  { %1776 = vst.msk [vmem:[%s3402_s7 + $0x90] sm:$0xff] %vm1757_vm2, %v1602_v4 }
 0x2fb   :  { %v1604_v28 = vpop.permute.xlu1 %1603 }
 0x2fc   :  { %1777 = vst.msk [vmem:[%s3402_s7 + $0x98] sm:$0xff] %vm1757_vm2, %v1604_v28 }
 0x2fd   :  { %v1598_v30 = vpop.permute.xlu0 %1597 }
 0x2fe   :  { %1774 = vst.msk [vmem:[%s3402_s7 + $0x80] sm:$0xff] %vm1757_vm2, %v1598_v30 }
 0x2ff   :  { %v1600_v31 = vpop.permute.xlu1 %1599 }
 0x300   :  { %1775 = vst.msk [vmem:[%s3402_s7 + $0x88] sm:$0xff] %vm1757_vm2, %v1600_v31 }
 0x301   :  { %v1610_v32 = vpop.permute.xlu0 %1609 }
 0x302   :  { %1780 = vst.msk [vmem:[%s3402_s7 + $0xb0] sm:$0xff] %vm1757_vm2, %v1610_v32 }
 0x303   :  { %v1612_v35 = vpop.permute.xlu1 %1611 }
 0x304   :  { %1781 = vst.msk [vmem:[%s3402_s7 + $0xb8] sm:$0xff] %vm1757_vm2, %v1612_v35 }
 0x305   :  { %v1606_v36 = vpop.permute.xlu0 %1605 }
 0x306   :  { %1778 = vst.msk [vmem:[%s3402_s7 + $0xa0] sm:$0xff] %vm1757_vm2, %v1606_v36 }
 0x307   :  { %v1608_v37 = vpop.permute.xlu1 %1607 }
 0x308   :  { %1779 = vst.msk [vmem:[%s3402_s7 + $0xa8] sm:$0xff] %vm1757_vm2, %v1608_v37 }
 0x309   :  { %v1618_v38 = vpop.permute.xlu0 %1617 }
 0x30a   :  { %1784 = vst.msk [vmem:[%s3402_s7 + $0xd0] sm:$0xff] %vm1757_vm2, %v1618_v38 }
 0x30b   :  { %v1620_v39 = vpop.permute.xlu1 %1619 }
 0x30c   :  { %1785 = vst.msk [vmem:[%s3402_s7 + $0xd8] sm:$0xff] %vm1757_vm2, %v1620_v39 }
 0x30d   :  { %v1614_v49 = vpop.permute.xlu0 %1613 }
 0x30e   :  { %1782 = vst.msk [vmem:[%s3402_s7 + $0xc0] sm:$0xff] %vm1757_vm2, %v1614_v49 }
 0x30f   :  { %v1616_v14 = vpop.permute.xlu1 %1615 }
 0x310   :  { %1783 = vst.msk [vmem:[%s3402_s7 + $0xc8] sm:$0xff] %vm1757_vm2, %v1616_v14 }
 0x311   :  { %v1626_v24 = vpop.permute.xlu0 %1625 }
 0x312   :  { %1788 = vst.msk [vmem:[%s3402_s7 + $0xf0] sm:$0xff] %vm1757_vm2, %v1626_v24 }
 0x313   :  { %v1628_v41 = vpop.permute.xlu1 %1627 }
 0x314   :  { %1789 = vst.msk [vmem:[%s3402_s7 + $0xf8] sm:$0xff] %vm1757_vm2, %v1628_v41 }
 0x315   :  { %v1622_v43 = vpop.permute.xlu0 %1621 }
 0x316   :  { %1786 = vst.msk [vmem:[%s3402_s7 + $0xe0] sm:$0xff] %vm1757_vm2, %v1622_v43 }
 0x317   :  { %v1624_v42 = vpop.permute.xlu1 %1623 }
 0x318   :  { %1787 = vst.msk [vmem:[%s3402_s7 + $0xe8] sm:$0xff] %vm1757_vm2, %v1624_v42 }
 0x319   :  { %v1634_v46 = vpop.permute.xlu0 %1633 }
 0x31a   :  { %1792 = vst.msk [vmem:[%s3402_s7 + $0x110] sm:$0xff] %vm1757_vm2, %v1634_v46 }
 0x31b   :  { %v1636_v47 = vpop.permute.xlu1 %1635 }
 0x31c   :  { %1793 = vst.msk [vmem:[%s3402_s7 + $0x118] sm:$0xff] %vm1757_vm2, %v1636_v47 }
 0x31d   :  { %v1630_v3 = vpop.permute.xlu0 %1629 }
 0x31e   :  { %1790 = vst.msk [vmem:[%s3402_s7 + $0x100] sm:$0xff] %vm1757_vm2, %v1630_v3 }
 0x31f   :  { %v1632_v48 = vpop.permute.xlu1 %1631 }
 0x320   :  { %1791 = vst.msk [vmem:[%s3402_s7 + $0x108] sm:$0xff] %vm1757_vm2, %v1632_v48 }
 0x321   :  { %v1642_v50 = vpop.permute.xlu0 %1641 }
 0x322   :  { %1796 = vst.msk [vmem:[%s3402_s7 + $0x130] sm:$0xff] %vm1757_vm2, %v1642_v50 }
 0x323   :  { %v1644_v23 = vpop.permute.xlu1 %1643 }
 0x324   :  { %1797 = vst.msk [vmem:[%s3402_s7 + $0x138] sm:$0xff] %vm1757_vm2, %v1644_v23 }
 0x325   :  { %v1638_v34 = vpop.permute.xlu0 %1637 }
 0x326   :  { %1794 = vst.msk [vmem:[%s3402_s7 + $0x120] sm:$0xff] %vm1757_vm2, %v1638_v34 }
 0x327   :  { %v1640_v45 = vpop.permute.xlu1 %1639 }
 0x328   :  { %1795 = vst.msk [vmem:[%s3402_s7 + $0x128] sm:$0xff] %vm1757_vm2, %v1640_v45 }
 0x329   :  { %v1650_v51 = vpop.permute.xlu0 %1649 }
 0x32a   :  { %1800 = vst.msk [vmem:[%s3402_s7 + $0x150] sm:$0xff] %vm1757_vm2, %v1650_v51 }
 0x32b   :  { %v1652_v52 = vpop.permute.xlu1 %1651 }
 0x32c   :  { %1801 = vst.msk [vmem:[%s3402_s7 + $0x158] sm:$0xff] %vm1757_vm2, %v1652_v52 }
 0x32d   :  { %v1646_v53 = vpop.permute.xlu0 %1645 }
 0x32e   :  { %1798 = vst.msk [vmem:[%s3402_s7 + $0x140] sm:$0xff] %vm1757_vm2, %v1646_v53 }
 0x32f   :  { %v1648_v54 = vpop.permute.xlu1 %1647 }
 0x330   :  { %1799 = vst.msk [vmem:[%s3402_s7 + $0x148] sm:$0xff] %vm1757_vm2, %v1648_v54 }
 0x331   :  { %v1658_v55 = vpop.permute.xlu0 %1657 }
 0x332   :  { %1804 = vst.msk [vmem:[%s3402_s7 + $0x170] sm:$0xff] %vm1757_vm2, %v1658_v55 }
 0x333   :  { %v1660_v59 = vpop.permute.xlu1 %1659 }
 0x334   :  { %1805 = vst.msk [vmem:[%s3402_s7 + $0x178] sm:$0xff] %vm1757_vm2, %v1660_v59 }
 0x335   :  { %v1654_v60 = vpop.permute.xlu0 %1653 }
 0x336   :  { %1802 = vst.msk [vmem:[%s3402_s7 + $0x160] sm:$0xff] %vm1757_vm2, %v1654_v60 }
 0x337   :  { %v1656_v61 = vpop.permute.xlu1 %1655 }
 0x338   :  { %1803 = vst.msk [vmem:[%s3402_s7 + $0x168] sm:$0xff] %vm1757_vm2, %v1656_v61 }
 0x339   :  { %v1666_v62 = vpop.permute.xlu0 %1665 }
 0x33a   :  { %1808 = vst.msk [vmem:[%s3402_s7 + $0x190] sm:$0xff] %vm1757_vm2, %v1666_v62 }
 0x33b   :  { %v1668_v0 = vpop.permute.xlu1 %1667 }
 0x33c   :  { %1809 = vst.msk [vmem:[%s3402_s7 + $0x198] sm:$0xff] %vm1757_vm2, %v1668_v0 }
 0x33d   :  { %v1662_v44 = vpop.permute.xlu0 %1661 }
 0x33e   :  { %1806 = vst.msk [vmem:[%s3402_s7 + $0x180] sm:$0xff] %vm1757_vm2, %v1662_v44 }
 0x33f   :  { %v1664_v1 = vpop.permute.xlu1 %1663 }
 0x340   :  { %1807 = vst.msk [vmem:[%s3402_s7 + $0x188] sm:$0xff] %vm1757_vm2, %v1664_v1 }
 0x341   :  { %v1674_v63 = vpop.permute.xlu0 %1673 }
 0x342   :  { %1812 = vst.msk [vmem:[%s3402_s7 + $0x1b0] sm:$0xff] %vm1757_vm2, %v1674_v63 }
 0x343   :  { %v1676_v57 = vpop.permute.xlu1 %1675 }
 0x344   :  { %1813 = vst.msk [vmem:[%s3402_s7 + $0x1b8] sm:$0xff] %vm1757_vm2, %v1676_v57 }
 0x345   :  { %v1670_v13 = vpop.permute.xlu0 %1669 }
 0x346   :  { %1810 = vst.msk [vmem:[%s3402_s7 + $0x1a0] sm:$0xff] %vm1757_vm2, %v1670_v13 }
 0x347   :  { %v1672_v2 = vpop.permute.xlu1 %1671 }
 0x348   :  { %1811 = vst.msk [vmem:[%s3402_s7 + $0x1a8] sm:$0xff] %vm1757_vm2, %v1672_v2 }
 0x349   :  { %v1682_v5 = vpop.permute.xlu0 %1681 }
 0x34a   :  { %1816 = vst.msk [vmem:[%s3402_s7 + $0x1d0] sm:$0xff] %vm1757_vm2, %v1682_v5 }
 0x34b   :  { %v1684_v9 = vpop.permute.xlu1 %1683 }
 0x34c   :  { %1817 = vst.msk [vmem:[%s3402_s7 + $0x1d8] sm:$0xff] %vm1757_vm2, %v1684_v9 }
 0x34d   :  { %v1678_v6 = vpop.permute.xlu0 %1677 }
 0x34e   :  { %1814 = vst.msk [vmem:[%s3402_s7 + $0x1c0] sm:$0xff] %vm1757_vm2, %v1678_v6 }
 0x34f   :  { %v1680_v7 = vpop.permute.xlu1 %1679 }
 0x350   :  { %1815 = vst.msk [vmem:[%s3402_s7 + $0x1c8] sm:$0xff] %vm1757_vm2, %v1680_v7 }
 0x351   :  { %v1686_v8 = vpop.permute.xlu0 %1685 }
 0x352   :  { %1818 = vst.msk [vmem:[%s3402_s7 + $0x1e0] sm:$0xff] %vm1757_vm2, %v1686_v8 }
 0x355   :  { %v1688_v10 = vpop.permute.xlu1 %1687  ;;  %v1690_v12 = vpop.permute.xlu0 %1689 }
 0x356   :  { %1819 = vst.msk [vmem:[%s3402_s7 + $0x1e8] sm:$0xff] %vm1757_vm2, %v1688_v10  ;;  %1820 = vst.msk [vmem:[%s3402_s7 + $0x1f0] sm:$0xff] %vm1757_vm2, %v1690_v12 }
 0x359   :  { %v1692_v40 = vpop.permute.xlu1 %1691 }
 0x35a   :  { %1821 = vst.msk [vmem:[%s3402_s7 + $0x1f8] sm:$0xff] %vm1757_vm2, %v1692_v40 }

</bundles_post_ra>
